<compile_context>
chip_gen: v5e
topology: v5e:2x2
jax: 0.10.0
libtpu: 0.0.40
codegen_flags: <defaults>
</compile_context>

<pallas_src>
import jax
import jax.numpy as jnp
import numpy as np
from jax import lax
from jax.experimental import pallas as pl
from jax.experimental.pallas import tpu as pltpu


def _bilinear_matrix(src, dst):
    """1-D bilinear interpolation matrix (dst, src), align_corners=True (numpy)."""
    if src == 1:
        m = np.zeros((dst, src), np.float64)
        m[:, 0] = 1.0
        return m
    coords = np.arange(dst, dtype=np.float64) * (src - 1) / (dst - 1)
    p0 = np.clip(np.floor(coords).astype(np.int64), 0, src - 1)
    p1 = np.minimum(p0 + 1, src - 1)
    frac = coords - p0
    m = np.zeros((dst, src), np.float64)
    m[np.arange(dst), p0] += 1.0 - frac
    m[np.arange(dst), p1] += frac
    return m


def _make_fusion_kernel(n_inputs, cins, sizes, resize, max_size, out_feats):
    """Kernel for one batch element: 9-matmul conv + kron-resize matmul + sum."""
    num_r = sum(resize)
    # Contract cin of (F, cin) with cin of (s*s, cin)  -> (F, s*s); i.e. A @ B^T.
    dn = (((1,), (1,)), ((), ()))

    def kernel(*refs):
        x_refs = refs[:n_inputs]                              # (1, s+2, s+2, c_i)
        w_refs = refs[n_inputs:2 * n_inputs]                  # (9, F, c_i)
        m_refs = refs[2 * n_inputs:2 * n_inputs + num_r]      # (s_i^2, max^2)
        o_ref = refs[2 * n_inputs + num_r]                    # (1, F, max^2)

        # Small accumulator (F * max^2 * 4B = a few KiB at these shapes) ->
        # keep it as a traced value; at RefineNet scale it would become an
        # explicit VMEM scratch.
        acc = jnp.zeros((out_feats, max_size * max_size), jnp.float32)
        r_idx = 0
        for i in range(n_inputs):
            s = sizes[i]
            cin = cins[i]

            # --- 3x3 conv, stride 1, pad 1, no bias: 9 accumulating matmuls
            #     straight from the padded input tile (no im2col scratch, no
            #     masked tap stores).  Output layout: (F, s*s), spatial in lanes.
            y = jnp.zeros((out_feats, s * s), jnp.float32)
            for dy in range(3):
                for dx in range(3):
                    t = dy * 3 + dx
                    tap = x_refs[i][0, dy:dy + s, dx:dx + s, :].reshape(s * s, cin)
                    y = y + lax.dot_general(
                        w_refs[i][t], tap, dn,
                        preferred_element_type=jnp.float32)   # (F, s*s)

            # --- bilinear upsample (align_corners=True) to (max, max): a
            #     single MXU matmul against the separable-kron matrix.
            if resize[i]:
                m_ref = m_refs[r_idx]
                r_idx += 1
                y = jnp.dot(y.astype(m_ref.dtype), m_ref[...],
                            preferred_element_type=jnp.float32)  # (F, max^2)

            acc = acc + y

        # Lane-dense NCHW-flat store: (F, H*W), spatial (max^2) in lanes.
        o_ref[0] = acc.astype(o_ref.dtype)

    return kernel


def multi_resolution_fusion(xs_nchw, weights_oihw, out_feats,
                            compute_dtype=jnp.float32):
    """xs_nchw: list of NCHW arrays; weights_oihw: list of (F, cin, 3, 3)."""
    n = len(xs_nchw)
    batch = int(xs_nchw[0].shape[0])
    for x in xs_nchw:
        # The module resizes to a square max_size; keep that assumption explicit.
        assert int(x.shape[2]) == int(x.shape[3]), "square spatial inputs expected"
    sizes = [int(x.shape[2]) for x in xs_nchw]
    cins = [int(x.shape[1]) for x in xs_nchw]
    max_size = max(sizes)
    resize = [s != max_size for s in sizes]

    # Glue: NCHW -> NHWC + zero halo for the 3x3 conv (stride=1, pad=1).
    # TODO(synk): at very large inputs move the halo padding in-kernel to
    # avoid the padded HBM copy (biggest relative win on v5e bandwidth).
    xs_pad = [jnp.pad(jnp.transpose(x, (0, 2, 3, 1)).astype(compute_dtype),
                      ((0, 0), (1, 1), (1, 1), (0, 0)))
              for x in xs_nchw]

    # OIHW -> (9, F, cin): one clean (F, cin) tap matrix per (dy, dx).
    w9s = [jnp.transpose(w, (2, 3, 0, 1)).reshape(9, out_feats, cins[i])
               .astype(compute_dtype)
           for i, w in enumerate(weights_oihw)]

    # Separable-kron bilinear matrices (s^2, max^2), align_corners=True.
    # kron(A, A)[H*max+W, h*s+w] = A[H,h]*A[W,w]; transpose -> (s^2, max^2).
    m_mats = []
    for s, r in zip(sizes, resize):
        if r:
            a = _bilinear_matrix(s, max_size)                  # (max, s) f64
            m = np.kron(a, a).T                                # (s^2, max^2)
            m_mats.append(jnp.asarray(m, dtype=compute_dtype))

    kernel = _make_fusion_kernel(n, cins, sizes, resize, max_size, out_feats)

    in_specs = []
    for x in xs_pad:
        hp, wp, c = (int(d) for d in x.shape[1:])
        in_specs.append(pl.BlockSpec((1, hp, wp, c), lambda b: (b, 0, 0, 0)))
    for w in w9s:
        in_specs.append(pl.BlockSpec(tuple(int(d) for d in w.shape),
                                     lambda b: (0, 0, 0)))
    for m in m_mats:
        in_specs.append(pl.BlockSpec(tuple(int(d) for d in m.shape),
                                     lambda b: (0, 0)))

    out_spec = pl.BlockSpec((1, out_feats, max_size * max_size),
                            lambda b: (b, 0, 0))

    out_flat = pl.pallas_call(
        kernel,
        out_shape=jax.ShapeDtypeStruct((batch, out_feats, max_size * max_size),
                                       jnp.float32),
        grid_spec=pltpu.PrefetchScalarGridSpec(
            num_scalar_prefetch=0,
            grid=(batch,),
            in_specs=in_specs,
            out_specs=out_spec),
        compiler_params=pltpu.CompilerParams(
            dimension_semantics=("parallel",)),
    )(*xs_pad, *w9s, *m_mats)

    # Output is already NCHW-flat: only a free reshape, no transpose pass.
    return out_flat.reshape(batch, out_feats, max_size, max_size)


def _reference(xs_nchw, weights_oihw):
    """Plain-JAX reference (lax conv + separable bilinear, align_corners=True)."""
    sizes = [int(x.shape[-1]) for x in xs_nchw]
    max_size = max(sizes)
    out = None
    for x, w, s in zip(xs_nchw, weights_oihw, sizes):
        y = lax.conv_general_dilated(
            x.astype(jnp.float32), w.astype(jnp.float32),
            window_strides=(1, 1), padding=((1, 1), (1, 1)),
            dimension_numbers=('NCHW', 'OIHW', 'NCHW'))
        if s != max_size:
            a = jnp.asarray(_bilinear_matrix(s, max_size), jnp.float32)
            y = jnp.einsum('hp,ncpq->nchq', a, y)
            y = jnp.einsum('wq,nchq->nchw', a, y)
        out = y if out is None else out + y
    return out


if __name__ == "__main__":
    key = jax.random.PRNGKey(0)
    k0, k1, kw0, kw1 = jax.random.split(key, 4)

    out_feats = 4
    # Module: MultiResolutionFusion(out_feats=4, (4, 16), (8, 8))
    x0 = jax.random.normal(k0, (2, 4, 16, 16), jnp.float32)   # NCHW, full res
    x1 = jax.random.normal(k1, (2, 8, 8, 8), jnp.float32)     # NCHW, half res
    # Deterministic synthetic conv weights (OIHW like nn.Conv2d), no bias.
    w0 = jax.random.normal(kw0, (out_feats, 4, 3, 3), jnp.float32) * 0.1
    w1 = jax.random.normal(kw1, (out_feats, 8, 3, 3), jnp.float32) * 0.1

    ref = _reference([x0, x1], [w0, w1])

    # f32 compute path (strict correctness check).
    out = multi_resolution_fusion([x0, x1], [w0, w1], out_feats)
    out = jax.block_until_ready(out)
    assert out.shape == (2, out_feats, 16, 16)
    assert np.allclose(np.asarray(out), np.asarray(ref), atol=1e-4, rtol=1e-4)

    # bf16 compute path (recommended on v6e/v7x), f32 accumulation.
    out_bf16 = multi_resolution_fusion([x0, x1], [w0, w1], out_feats,
                                       compute_dtype=jnp.bfloat16)
    out_bf16 = jax.block_until_ready(out_bf16)
    assert np.allclose(np.asarray(out_bf16), np.asarray(ref),
                       atol=5e-2, rtol=5e-2)

    print("KERNEL_OK")
</pallas_src>

<mosaic_0001>
module attributes {stable_mosaic.version = 11 : i64} {
  func.func @kernel(%arg0: i32, %arg1: memref<1x18x18x4xf32, #tpu.memory_space<vmem>>, %arg2: memref<1x10x10x8xf32, #tpu.memory_space<vmem>>, %arg3: memref<9x4x4xf32, #tpu.memory_space<vmem>>, %arg4: memref<9x4x8xf32, #tpu.memory_space<vmem>>, %arg5: memref<64x256xf32, #tpu.memory_space<vmem>>, %arg6: memref<1x4x256xf32, #tpu.memory_space<vmem>>) attributes {dimension_semantics = [#tpu.dimension_semantics<parallel>], iteration_bounds = array<i64: 2>, scalar_prefetch = 0 : i64, scratch_operands = 0 : i64, tpu.core_type = #tpu.core_type<tc>, window_params = [{transform_indices = @transform_0, window_bounds = array<i64: 1, 18, 18, 4>}, {transform_indices = @transform_1, window_bounds = array<i64: 1, 10, 10, 8>}, {pipeline_mode = #tpu.pipeline_mode<synchronous>, transform_indices = @transform_2, window_bounds = array<i64: 9, 4, 4>}, {pipeline_mode = #tpu.pipeline_mode<synchronous>, transform_indices = @transform_3, window_bounds = array<i64: 9, 4, 8>}, {pipeline_mode = #tpu.pipeline_mode<synchronous>, transform_indices = @transform_4, window_bounds = array<i64: 64, 256>}, {transform_indices = @transform_5, window_bounds = array<i64: 1, 4, 256>}]} {
    %cst = arith.constant 0.000000e+00 : f32
    %0 = vector.broadcast %cst : f32 to vector<4x256xf32>
    %cst_0 = arith.constant 0.000000e+00 : f32
    %1 = vector.broadcast %cst_0 : f32 to vector<4x256xf32>
    %c0 = arith.constant 0 : index
    %c0_1 = arith.constant 0 : index
    %c0_2 = arith.constant 0 : index
    %c0_3 = arith.constant 0 : index
    %2 = vector.load %arg1[%c0, %c0_1, %c0_2, %c0_3] : memref<1x18x18x4xf32, #tpu.memory_space<vmem>>, vector<1x16x16x4xf32>
    %3 = vector.shape_cast %2 : vector<1x16x16x4xf32> to vector<16x16x4xf32>
    %4 = vector.shape_cast %3 : vector<16x16x4xf32> to vector<256x4xf32>
    %c0_4 = arith.constant 0 : index
    %c0_5 = arith.constant 0 : index
    %c0_6 = arith.constant 0 : index
    %5 = vector.load %arg3[%c0_4, %c0_5, %c0_6] : memref<9x4x4xf32, #tpu.memory_space<vmem>>, vector<1x4x4xf32>
    %6 = vector.shape_cast %5 : vector<1x4x4xf32> to vector<4x4xf32>
    %cst_7 = arith.constant dense<0.000000e+00> : vector<4x256xf32>
    %7 = tpu.matmul %6, %4, %cst_7 {dimension_numbers = #tpu.dot_dimension_numbers<[1], [1], [0], [0], [0, 0, 1, 0], [], []>} : vector<4x4xf32>, vector<256x4xf32>, vector<4x256xf32> -> vector<4x256xf32>
    %8 = arith.addf %1, %7 : vector<4x256xf32>
    %c0_8 = arith.constant 0 : index
    %c0_9 = arith.constant 0 : index
    %c1 = arith.constant 1 : index
    %c0_10 = arith.constant 0 : index
    %9 = vector.load %arg1[%c0_8, %c0_9, %c1, %c0_10] : memref<1x18x18x4xf32, #tpu.memory_space<vmem>>, vector<1x16x16x4xf32>
    %10 = vector.shape_cast %9 : vector<1x16x16x4xf32> to vector<16x16x4xf32>
    %11 = vector.shape_cast %10 : vector<16x16x4xf32> to vector<256x4xf32>
    %c1_11 = arith.constant 1 : index
    %c0_12 = arith.constant 0 : index
    %c0_13 = arith.constant 0 : index
    %12 = vector.load %arg3[%c1_11, %c0_12, %c0_13] : memref<9x4x4xf32, #tpu.memory_space<vmem>>, vector<1x4x4xf32>
    %13 = vector.shape_cast %12 : vector<1x4x4xf32> to vector<4x4xf32>
    %cst_14 = arith.constant dense<0.000000e+00> : vector<4x256xf32>
    %14 = tpu.matmul %13, %11, %cst_14 {dimension_numbers = #tpu.dot_dimension_numbers<[1], [1], [0], [0], [0, 0, 1, 0], [], []>} : vector<4x4xf32>, vector<256x4xf32>, vector<4x256xf32> -> vector<4x256xf32>
    %15 = arith.addf %8, %14 : vector<4x256xf32>
    %c0_15 = arith.constant 0 : index
    %c0_16 = arith.constant 0 : index
    %c2 = arith.constant 2 : index
    %c0_17 = arith.constant 0 : index
    %16 = vector.load %arg1[%c0_15, %c0_16, %c2, %c0_17] : memref<1x18x18x4xf32, #tpu.memory_space<vmem>>, vector<1x16x16x4xf32>
    %17 = vector.shape_cast %16 : vector<1x16x16x4xf32> to vector<16x16x4xf32>
    %18 = vector.shape_cast %17 : vector<16x16x4xf32> to vector<256x4xf32>
    %c2_18 = arith.constant 2 : index
    %c0_19 = arith.constant 0 : index
    %c0_20 = arith.constant 0 : index
    %19 = vector.load %arg3[%c2_18, %c0_19, %c0_20] : memref<9x4x4xf32, #tpu.memory_space<vmem>>, vector<1x4x4xf32>
    %20 = vector.shape_cast %19 : vector<1x4x4xf32> to vector<4x4xf32>
    %cst_21 = arith.constant dense<0.000000e+00> : vector<4x256xf32>
    %21 = tpu.matmul %20, %18, %cst_21 {dimension_numbers = #tpu.dot_dimension_numbers<[1], [1], [0], [0], [0, 0, 1, 0], [], []>} : vector<4x4xf32>, vector<256x4xf32>, vector<4x256xf32> -> vector<4x256xf32>
    %22 = arith.addf %15, %21 : vector<4x256xf32>
    %c0_22 = arith.constant 0 : index
    %c1_23 = arith.constant 1 : index
    %c0_24 = arith.constant 0 : index
    %c0_25 = arith.constant 0 : index
    %23 = vector.load %arg1[%c0_22, %c1_23, %c0_24, %c0_25] : memref<1x18x18x4xf32, #tpu.memory_space<vmem>>, vector<1x16x16x4xf32>
    %24 = vector.shape_cast %23 : vector<1x16x16x4xf32> to vector<16x16x4xf32>
    %25 = vector.shape_cast %24 : vector<16x16x4xf32> to vector<256x4xf32>
    %c3 = arith.constant 3 : index
    %c0_26 = arith.constant 0 : index
    %c0_27 = arith.constant 0 : index
    %26 = vector.load %arg3[%c3, %c0_26, %c0_27] : memref<9x4x4xf32, #tpu.memory_space<vmem>>, vector<1x4x4xf32>
    %27 = vector.shape_cast %26 : vector<1x4x4xf32> to vector<4x4xf32>
    %cst_28 = arith.constant dense<0.000000e+00> : vector<4x256xf32>
    %28 = tpu.matmul %27, %25, %cst_28 {dimension_numbers = #tpu.dot_dimension_numbers<[1], [1], [0], [0], [0, 0, 1, 0], [], []>} : vector<4x4xf32>, vector<256x4xf32>, vector<4x256xf32> -> vector<4x256xf32>
    %29 = arith.addf %22, %28 : vector<4x256xf32>
    %c0_29 = arith.constant 0 : index
    %c1_30 = arith.constant 1 : index
    %c1_31 = arith.constant 1 : index
    %c0_32 = arith.constant 0 : index
    %30 = vector.load %arg1[%c0_29, %c1_30, %c1_31, %c0_32] : memref<1x18x18x4xf32, #tpu.memory_space<vmem>>, vector<1x16x16x4xf32>
    %31 = vector.shape_cast %30 : vector<1x16x16x4xf32> to vector<16x16x4xf32>
    %32 = vector.shape_cast %31 : vector<16x16x4xf32> to vector<256x4xf32>
    %c4 = arith.constant 4 : index
    %c0_33 = arith.constant 0 : index
    %c0_34 = arith.constant 0 : index
    %33 = vector.load %arg3[%c4, %c0_33, %c0_34] : memref<9x4x4xf32, #tpu.memory_space<vmem>>, vector<1x4x4xf32>
    %34 = vector.shape_cast %33 : vector<1x4x4xf32> to vector<4x4xf32>
    %cst_35 = arith.constant dense<0.000000e+00> : vector<4x256xf32>
    %35 = tpu.matmul %34, %32, %cst_35 {dimension_numbers = #tpu.dot_dimension_numbers<[1], [1], [0], [0], [0, 0, 1, 0], [], []>} : vector<4x4xf32>, vector<256x4xf32>, vector<4x256xf32> -> vector<4x256xf32>
    %36 = arith.addf %29, %35 : vector<4x256xf32>
    %c0_36 = arith.constant 0 : index
    %c1_37 = arith.constant 1 : index
    %c2_38 = arith.constant 2 : index
    %c0_39 = arith.constant 0 : index
    %37 = vector.load %arg1[%c0_36, %c1_37, %c2_38, %c0_39] : memref<1x18x18x4xf32, #tpu.memory_space<vmem>>, vector<1x16x16x4xf32>
    %38 = vector.shape_cast %37 : vector<1x16x16x4xf32> to vector<16x16x4xf32>
    %39 = vector.shape_cast %38 : vector<16x16x4xf32> to vector<256x4xf32>
    %c5 = arith.constant 5 : index
    %c0_40 = arith.constant 0 : index
    %c0_41 = arith.constant 0 : index
    %40 = vector.load %arg3[%c5, %c0_40, %c0_41] : memref<9x4x4xf32, #tpu.memory_space<vmem>>, vector<1x4x4xf32>
    %41 = vector.shape_cast %40 : vector<1x4x4xf32> to vector<4x4xf32>
    %cst_42 = arith.constant dense<0.000000e+00> : vector<4x256xf32>
    %42 = tpu.matmul %41, %39, %cst_42 {dimension_numbers = #tpu.dot_dimension_numbers<[1], [1], [0], [0], [0, 0, 1, 0], [], []>} : vector<4x4xf32>, vector<256x4xf32>, vector<4x256xf32> -> vector<4x256xf32>
    %43 = arith.addf %36, %42 : vector<4x256xf32>
    %c0_43 = arith.constant 0 : index
    %c2_44 = arith.constant 2 : index
    %c0_45 = arith.constant 0 : index
    %c0_46 = arith.constant 0 : index
    %44 = vector.load %arg1[%c0_43, %c2_44, %c0_45, %c0_46] : memref<1x18x18x4xf32, #tpu.memory_space<vmem>>, vector<1x16x16x4xf32>
    %45 = vector.shape_cast %44 : vector<1x16x16x4xf32> to vector<16x16x4xf32>
    %46 = vector.shape_cast %45 : vector<16x16x4xf32> to vector<256x4xf32>
    %c6 = arith.constant 6 : index
    %c0_47 = arith.constant 0 : index
    %c0_48 = arith.constant 0 : index
    %47 = vector.load %arg3[%c6, %c0_47, %c0_48] : memref<9x4x4xf32, #tpu.memory_space<vmem>>, vector<1x4x4xf32>
    %48 = vector.shape_cast %47 : vector<1x4x4xf32> to vector<4x4xf32>
    %cst_49 = arith.constant dense<0.000000e+00> : vector<4x256xf32>
    %49 = tpu.matmul %48, %46, %cst_49 {dimension_numbers = #tpu.dot_dimension_numbers<[1], [1], [0], [0], [0, 0, 1, 0], [], []>} : vector<4x4xf32>, vector<256x4xf32>, vector<4x256xf32> -> vector<4x256xf32>
    %50 = arith.addf %43, %49 : vector<4x256xf32>
    %c0_50 = arith.constant 0 : index
    %c2_51 = arith.constant 2 : index
    %c1_52 = arith.constant 1 : index
    %c0_53 = arith.constant 0 : index
    %51 = vector.load %arg1[%c0_50, %c2_51, %c1_52, %c0_53] : memref<1x18x18x4xf32, #tpu.memory_space<vmem>>, vector<1x16x16x4xf32>
    %52 = vector.shape_cast %51 : vector<1x16x16x4xf32> to vector<16x16x4xf32>
    %53 = vector.shape_cast %52 : vector<16x16x4xf32> to vector<256x4xf32>
    %c7 = arith.constant 7 : index
    %c0_54 = arith.constant 0 : index
    %c0_55 = arith.constant 0 : index
    %54 = vector.load %arg3[%c7, %c0_54, %c0_55] : memref<9x4x4xf32, #tpu.memory_space<vmem>>, vector<1x4x4xf32>
    %55 = vector.shape_cast %54 : vector<1x4x4xf32> to vector<4x4xf32>
    %cst_56 = arith.constant dense<0.000000e+00> : vector<4x256xf32>
    %56 = tpu.matmul %55, %53, %cst_56 {dimension_numbers = #tpu.dot_dimension_numbers<[1], [1], [0], [0], [0, 0, 1, 0], [], []>} : vector<4x4xf32>, vector<256x4xf32>, vector<4x256xf32> -> vector<4x256xf32>
    %57 = arith.addf %50, %56 : vector<4x256xf32>
    %c0_57 = arith.constant 0 : index
    %c2_58 = arith.constant 2 : index
    %c2_59 = arith.constant 2 : index
    %c0_60 = arith.constant 0 : index
    %58 = vector.load %arg1[%c0_57, %c2_58, %c2_59, %c0_60] : memref<1x18x18x4xf32, #tpu.memory_space<vmem>>, vector<1x16x16x4xf32>
    %59 = vector.shape_cast %58 : vector<1x16x16x4xf32> to vector<16x16x4xf32>
    %60 = vector.shape_cast %59 : vector<16x16x4xf32> to vector<256x4xf32>
    %c8 = arith.constant 8 : index
    %c0_61 = arith.constant 0 : index
    %c0_62 = arith.constant 0 : index
    %61 = vector.load %arg3[%c8, %c0_61, %c0_62] : memref<9x4x4xf32, #tpu.memory_space<vmem>>, vector<1x4x4xf32>
    %62 = vector.shape_cast %61 : vector<1x4x4xf32> to vector<4x4xf32>
    %cst_63 = arith.constant dense<0.000000e+00> : vector<4x256xf32>
    %63 = tpu.matmul %62, %60, %cst_63 {dimension_numbers = #tpu.dot_dimension_numbers<[1], [1], [0], [0], [0, 0, 1, 0], [], []>} : vector<4x4xf32>, vector<256x4xf32>, vector<4x256xf32> -> vector<4x256xf32>
    %64 = arith.addf %57, %63 : vector<4x256xf32>
    %65 = arith.addf %0, %64 : vector<4x256xf32>
    %cst_64 = arith.constant 0.000000e+00 : f32
    %66 = vector.broadcast %cst_64 : f32 to vector<4x64xf32>
    %c0_65 = arith.constant 0 : index
    %c0_66 = arith.constant 0 : index
    %c0_67 = arith.constant 0 : index
    %c0_68 = arith.constant 0 : index
    %67 = vector.load %arg2[%c0_65, %c0_66, %c0_67, %c0_68] : memref<1x10x10x8xf32, #tpu.memory_space<vmem>>, vector<1x8x8x8xf32>
    %68 = vector.shape_cast %67 : vector<1x8x8x8xf32> to vector<8x8x8xf32>
    %69 = vector.shape_cast %68 : vector<8x8x8xf32> to vector<64x8xf32>
    %c0_69 = arith.constant 0 : index
    %c0_70 = arith.constant 0 : index
    %c0_71 = arith.constant 0 : index
    %70 = vector.load %arg4[%c0_69, %c0_70, %c0_71] : memref<9x4x8xf32, #tpu.memory_space<vmem>>, vector<1x4x8xf32>
    %71 = vector.shape_cast %70 : vector<1x4x8xf32> to vector<4x8xf32>
    %cst_72 = arith.constant dense<0.000000e+00> : vector<4x64xf32>
    %72 = tpu.matmul %71, %69, %cst_72 {dimension_numbers = #tpu.dot_dimension_numbers<[1], [1], [0], [0], [0, 0, 1, 0], [], []>} : vector<4x8xf32>, vector<64x8xf32>, vector<4x64xf32> -> vector<4x64xf32>
    %73 = arith.addf %66, %72 : vector<4x64xf32>
    %c0_73 = arith.constant 0 : index
    %c0_74 = arith.constant 0 : index
    %c1_75 = arith.constant 1 : index
    %c0_76 = arith.constant 0 : index
    %74 = vector.load %arg2[%c0_73, %c0_74, %c1_75, %c0_76] : memref<1x10x10x8xf32, #tpu.memory_space<vmem>>, vector<1x8x8x8xf32>
    %75 = vector.shape_cast %74 : vector<1x8x8x8xf32> to vector<8x8x8xf32>
    %76 = vector.shape_cast %75 : vector<8x8x8xf32> to vector<64x8xf32>
    %c1_77 = arith.constant 1 : index
    %c0_78 = arith.constant 0 : index
    %c0_79 = arith.constant 0 : index
    %77 = vector.load %arg4[%c1_77, %c0_78, %c0_79] : memref<9x4x8xf32, #tpu.memory_space<vmem>>, vector<1x4x8xf32>
    %78 = vector.shape_cast %77 : vector<1x4x8xf32> to vector<4x8xf32>
    %cst_80 = arith.constant dense<0.000000e+00> : vector<4x64xf32>
    %79 = tpu.matmul %78, %76, %cst_80 {dimension_numbers = #tpu.dot_dimension_numbers<[1], [1], [0], [0], [0, 0, 1, 0], [], []>} : vector<4x8xf32>, vector<64x8xf32>, vector<4x64xf32> -> vector<4x64xf32>
    %80 = arith.addf %73, %79 : vector<4x64xf32>
    %c0_81 = arith.constant 0 : index
    %c0_82 = arith.constant 0 : index
    %c2_83 = arith.constant 2 : index
    %c0_84 = arith.constant 0 : index
    %81 = vector.load %arg2[%c0_81, %c0_82, %c2_83, %c0_84] : memref<1x10x10x8xf32, #tpu.memory_space<vmem>>, vector<1x8x8x8xf32>
    %82 = vector.shape_cast %81 : vector<1x8x8x8xf32> to vector<8x8x8xf32>
    %83 = vector.shape_cast %82 : vector<8x8x8xf32> to vector<64x8xf32>
    %c2_85 = arith.constant 2 : index
    %c0_86 = arith.constant 0 : index
    %c0_87 = arith.constant 0 : index
    %84 = vector.load %arg4[%c2_85, %c0_86, %c0_87] : memref<9x4x8xf32, #tpu.memory_space<vmem>>, vector<1x4x8xf32>
    %85 = vector.shape_cast %84 : vector<1x4x8xf32> to vector<4x8xf32>
    %cst_88 = arith.constant dense<0.000000e+00> : vector<4x64xf32>
    %86 = tpu.matmul %85, %83, %cst_88 {dimension_numbers = #tpu.dot_dimension_numbers<[1], [1], [0], [0], [0, 0, 1, 0], [], []>} : vector<4x8xf32>, vector<64x8xf32>, vector<4x64xf32> -> vector<4x64xf32>
    %87 = arith.addf %80, %86 : vector<4x64xf32>
    %c0_89 = arith.constant 0 : index
    %c1_90 = arith.constant 1 : index
    %c0_91 = arith.constant 0 : index
    %c0_92 = arith.constant 0 : index
    %88 = vector.load %arg2[%c0_89, %c1_90, %c0_91, %c0_92] : memref<1x10x10x8xf32, #tpu.memory_space<vmem>>, vector<1x8x8x8xf32>
    %89 = vector.shape_cast %88 : vector<1x8x8x8xf32> to vector<8x8x8xf32>
    %90 = vector.shape_cast %89 : vector<8x8x8xf32> to vector<64x8xf32>
    %c3_93 = arith.constant 3 : index
    %c0_94 = arith.constant 0 : index
    %c0_95 = arith.constant 0 : index
    %91 = vector.load %arg4[%c3_93, %c0_94, %c0_95] : memref<9x4x8xf32, #tpu.memory_space<vmem>>, vector<1x4x8xf32>
    %92 = vector.shape_cast %91 : vector<1x4x8xf32> to vector<4x8xf32>
    %cst_96 = arith.constant dense<0.000000e+00> : vector<4x64xf32>
    %93 = tpu.matmul %92, %90, %cst_96 {dimension_numbers = #tpu.dot_dimension_numbers<[1], [1], [0], [0], [0, 0, 1, 0], [], []>} : vector<4x8xf32>, vector<64x8xf32>, vector<4x64xf32> -> vector<4x64xf32>
    %94 = arith.addf %87, %93 : vector<4x64xf32>
    %c0_97 = arith.constant 0 : index
    %c1_98 = arith.constant 1 : index
    %c1_99 = arith.constant 1 : index
    %c0_100 = arith.constant 0 : index
    %95 = vector.load %arg2[%c0_97, %c1_98, %c1_99, %c0_100] : memref<1x10x10x8xf32, #tpu.memory_space<vmem>>, vector<1x8x8x8xf32>
    %96 = vector.shape_cast %95 : vector<1x8x8x8xf32> to vector<8x8x8xf32>
    %97 = vector.shape_cast %96 : vector<8x8x8xf32> to vector<64x8xf32>
    %c4_101 = arith.constant 4 : index
    %c0_102 = arith.constant 0 : index
    %c0_103 = arith.constant 0 : index
    %98 = vector.load %arg4[%c4_101, %c0_102, %c0_103] : memref<9x4x8xf32, #tpu.memory_space<vmem>>, vector<1x4x8xf32>
    %99 = vector.shape_cast %98 : vector<1x4x8xf32> to vector<4x8xf32>
    %cst_104 = arith.constant dense<0.000000e+00> : vector<4x64xf32>
    %100 = tpu.matmul %99, %97, %cst_104 {dimension_numbers = #tpu.dot_dimension_numbers<[1], [1], [0], [0], [0, 0, 1, 0], [], []>} : vector<4x8xf32>, vector<64x8xf32>, vector<4x64xf32> -> vector<4x64xf32>
    %101 = arith.addf %94, %100 : vector<4x64xf32>
    %c0_105 = arith.constant 0 : index
    %c1_106 = arith.constant 1 : index
    %c2_107 = arith.constant 2 : index
    %c0_108 = arith.constant 0 : index
    %102 = vector.load %arg2[%c0_105, %c1_106, %c2_107, %c0_108] : memref<1x10x10x8xf32, #tpu.memory_space<vmem>>, vector<1x8x8x8xf32>
    %103 = vector.shape_cast %102 : vector<1x8x8x8xf32> to vector<8x8x8xf32>
    %104 = vector.shape_cast %103 : vector<8x8x8xf32> to vector<64x8xf32>
    %c5_109 = arith.constant 5 : index
    %c0_110 = arith.constant 0 : index
    %c0_111 = arith.constant 0 : index
    %105 = vector.load %arg4[%c5_109, %c0_110, %c0_111] : memref<9x4x8xf32, #tpu.memory_space<vmem>>, vector<1x4x8xf32>
    %106 = vector.shape_cast %105 : vector<1x4x8xf32> to vector<4x8xf32>
    %cst_112 = arith.constant dense<0.000000e+00> : vector<4x64xf32>
    %107 = tpu.matmul %106, %104, %cst_112 {dimension_numbers = #tpu.dot_dimension_numbers<[1], [1], [0], [0], [0, 0, 1, 0], [], []>} : vector<4x8xf32>, vector<64x8xf32>, vector<4x64xf32> -> vector<4x64xf32>
    %108 = arith.addf %101, %107 : vector<4x64xf32>
    %c0_113 = arith.constant 0 : index
    %c2_114 = arith.constant 2 : index
    %c0_115 = arith.constant 0 : index
    %c0_116 = arith.constant 0 : index
    %109 = vector.load %arg2[%c0_113, %c2_114, %c0_115, %c0_116] : memref<1x10x10x8xf32, #tpu.memory_space<vmem>>, vector<1x8x8x8xf32>
    %110 = vector.shape_cast %109 : vector<1x8x8x8xf32> to vector<8x8x8xf32>
    %111 = vector.shape_cast %110 : vector<8x8x8xf32> to vector<64x8xf32>
    %c6_117 = arith.constant 6 : index
    %c0_118 = arith.constant 0 : index
    %c0_119 = arith.constant 0 : index
    %112 = vector.load %arg4[%c6_117, %c0_118, %c0_119] : memref<9x4x8xf32, #tpu.memory_space<vmem>>, vector<1x4x8xf32>
    %113 = vector.shape_cast %112 : vector<1x4x8xf32> to vector<4x8xf32>
    %cst_120 = arith.constant dense<0.000000e+00> : vector<4x64xf32>
    %114 = tpu.matmul %113, %111, %cst_120 {dimension_numbers = #tpu.dot_dimension_numbers<[1], [1], [0], [0], [0, 0, 1, 0], [], []>} : vector<4x8xf32>, vector<64x8xf32>, vector<4x64xf32> -> vector<4x64xf32>
    %115 = arith.addf %108, %114 : vector<4x64xf32>
    %c0_121 = arith.constant 0 : index
    %c2_122 = arith.constant 2 : index
    %c1_123 = arith.constant 1 : index
    %c0_124 = arith.constant 0 : index
    %116 = vector.load %arg2[%c0_121, %c2_122, %c1_123, %c0_124] : memref<1x10x10x8xf32, #tpu.memory_space<vmem>>, vector<1x8x8x8xf32>
    %117 = vector.shape_cast %116 : vector<1x8x8x8xf32> to vector<8x8x8xf32>
    %118 = vector.shape_cast %117 : vector<8x8x8xf32> to vector<64x8xf32>
    %c7_125 = arith.constant 7 : index
    %c0_126 = arith.constant 0 : index
    %c0_127 = arith.constant 0 : index
    %119 = vector.load %arg4[%c7_125, %c0_126, %c0_127] : memref<9x4x8xf32, #tpu.memory_space<vmem>>, vector<1x4x8xf32>
    %120 = vector.shape_cast %119 : vector<1x4x8xf32> to vector<4x8xf32>
    %cst_128 = arith.constant dense<0.000000e+00> : vector<4x64xf32>
    %121 = tpu.matmul %120, %118, %cst_128 {dimension_numbers = #tpu.dot_dimension_numbers<[1], [1], [0], [0], [0, 0, 1, 0], [], []>} : vector<4x8xf32>, vector<64x8xf32>, vector<4x64xf32> -> vector<4x64xf32>
    %122 = arith.addf %115, %121 : vector<4x64xf32>
    %c0_129 = arith.constant 0 : index
    %c2_130 = arith.constant 2 : index
    %c2_131 = arith.constant 2 : index
    %c0_132 = arith.constant 0 : index
    %123 = vector.load %arg2[%c0_129, %c2_130, %c2_131, %c0_132] : memref<1x10x10x8xf32, #tpu.memory_space<vmem>>, vector<1x8x8x8xf32>
    %124 = vector.shape_cast %123 : vector<1x8x8x8xf32> to vector<8x8x8xf32>
    %125 = vector.shape_cast %124 : vector<8x8x8xf32> to vector<64x8xf32>
    %c8_133 = arith.constant 8 : index
    %c0_134 = arith.constant 0 : index
    %c0_135 = arith.constant 0 : index
    %126 = vector.load %arg4[%c8_133, %c0_134, %c0_135] : memref<9x4x8xf32, #tpu.memory_space<vmem>>, vector<1x4x8xf32>
    %127 = vector.shape_cast %126 : vector<1x4x8xf32> to vector<4x8xf32>
    %cst_136 = arith.constant dense<0.000000e+00> : vector<4x64xf32>
    %128 = tpu.matmul %127, %125, %cst_136 {dimension_numbers = #tpu.dot_dimension_numbers<[1], [1], [0], [0], [0, 0, 1, 0], [], []>} : vector<4x8xf32>, vector<64x8xf32>, vector<4x64xf32> -> vector<4x64xf32>
    %129 = arith.addf %122, %128 : vector<4x64xf32>
    %c0_137 = arith.constant 0 : index
    %c0_138 = arith.constant 0 : index
    %130 = vector.load %arg5[%c0_137, %c0_138] : memref<64x256xf32, #tpu.memory_space<vmem>>, vector<64x256xf32>
    %cst_139 = arith.constant dense<0.000000e+00> : vector<4x256xf32>
    %131 = tpu.matmul %129, %130, %cst_139 {dimension_numbers = #tpu.dot_dimension_numbers<[1], [0], [0], [1], [0, 0, 1, 1], [], []>} : vector<4x64xf32>, vector<64x256xf32>, vector<4x256xf32> -> vector<4x256xf32>
    %132 = arith.addf %65, %131 : vector<4x256xf32>
    %c0_140 = arith.constant 0 : index
    %c0_141 = arith.constant 0 : index
    %c0_142 = arith.constant 0 : index
    %133 = vector.load %arg6[%c0_140, %c0_141, %c0_142] : memref<1x4x256xf32, #tpu.memory_space<vmem>>, vector<1x4x256xf32>
    %134 = vector.shape_cast %133 : vector<1x4x256xf32> to vector<4x256xf32>
    %135 = vector.shape_cast %132 : vector<4x256xf32> to vector<1x4x256xf32>
    tpu.vector_store %arg6[%c0_140, %c0_141, %c0_142], %135 {strides = array<i32>} : memref<1x4x256xf32, #tpu.memory_space<vmem>>, vector<1x4x256xf32>,
    return
  }
  func.func @transform_0(%arg0: i32) -> (i32, i32, i32, i32) {
    %c0_i32 = arith.constant 0 : i32
    %c0_i32_0 = arith.constant 0 : i32
    %c0_i32_1 = arith.constant 0 : i32
    %c0_i32_2 = arith.constant 0 : i32
    return %arg0, %c0_i32, %c0_i32_0, %c0_i32_1 : i32, i32, i32, i32
  }
  func.func @transform_1(%arg0: i32) -> (i32, i32, i32, i32) {
    %c0_i32 = arith.constant 0 : i32
    %c0_i32_0 = arith.constant 0 : i32
    %c0_i32_1 = arith.constant 0 : i32
    %c0_i32_2 = arith.constant 0 : i32
    return %arg0, %c0_i32, %c0_i32_0, %c0_i32_1 : i32, i32, i32, i32
  }
  func.func @transform_2(%arg0: i32) -> (i32, i32, i32) {
    %c0_i32 = arith.constant 0 : i32
    %c0_i32_0 = arith.constant 0 : i32
    %c0_i32_1 = arith.constant 0 : i32
    %c0_i32_2 = arith.constant 0 : i32
    return %c0_i32, %c0_i32_0, %c0_i32_1 : i32, i32, i32
  }
  func.func @transform_3(%arg0: i32) -> (i32, i32, i32) {
    %c0_i32 = arith.constant 0 : i32
    %c0_i32_0 = arith.constant 0 : i32
    %c0_i32_1 = arith.constant 0 : i32
    %c0_i32_2 = arith.constant 0 : i32
    return %c0_i32, %c0_i32_0, %c0_i32_1 : i32, i32, i32
  }
  func.func @transform_4(%arg0: i32) -> (i32, i32) {
    %c0_i32 = arith.constant 0 : i32
    %c0_i32_0 = arith.constant 0 : i32
    %c0_i32_1 = arith.constant 0 : i32
    return %c0_i32, %c0_i32_0 : i32, i32
  }
  func.func @transform_5(%arg0: i32) -> (i32, i32, i32) {
    %c0_i32 = arith.constant 0 : i32
    %c0_i32_0 = arith.constant 0 : i32
    %c0_i32_1 = arith.constant 0 : i32
    return %arg0, %c0_i32, %c0_i32_0 : i32, i32, i32
  }
}

</mosaic_0001>

<bundles_post_ra>
// kernel: tpu_custom_call.1
= control target key start
LH: loop header
LB: loop body
LE: loop exit
PB: predicated region body
PF: predicated region fallthrough
CT: control target
= control target key end

     0   :  { %10 = vsyncpa [#allocation3], 0  ;;  %s4588_s0 = inlined_call_operand.vmem [shape: f32[2,18,18,4], index: 0, kind: input, shape index: {}]   ;;  %s4589_s1 = inlined_call_operand.vmem [shape: f32[2,10,10,8], index: 1, kind: input, shape index: {}]   ;;  %s4590_s2 = inlined_call_operand.vmem [shape: f32[9,4,4], index: 2, kind: input, shape index: {}]   ;;  %s4591_s3 = inlined_call_operand.vmem [shape: f32[9,4,8], index: 3, kind: input, shape index: {}]   ;;  %s4592_s4 = inlined_call_operand.vmem [shape: f32[64,256], index: 4, kind: input, shape index: {}]   ;;  %s4593_s5 = inlined_call_operand.hbm [shape: f32[2,4,256], index: 5, kind: output, shape index: {}]  }
   0x1   :  { %12 = vsyncpa [#allocation3 + $0x1], 0  ;;  %s3290_s18 = smov 0   ;;  %s3292_s19 = smov 0  }
   0x2   :  { %s3294_s20 = smov 0   ;;  %s3296_s21 = smov 0  }
   0x3 LB: > { %s3311_s22 = sadd.s32 4294967295, %s3258_s21   ;;  %s2497_s23 = sadd.s32 4294967294, %s3258_s21   ;;  %s3258_s21 = sphi %s3296_s21, %s4709_s21   ;;  %s3254_s20 = sphi %s3294_s20, %s4708_s20   ;;  %s3250_s19 = sphi %s3292_s19, %s4707_s19   ;;  %s3246_s18 = sphi %s3290_s18, %s4706_s18  }
   0x4   : > { %s3315_s24 = sadd.s32 1, %s3258_s21   ;;  %s140_s25 = sadd.s32 1, %s3254_s20 }
   0x5   : > { %s137_s26 = ssub.s32 %s3258_s21, %s3315_s24  ;;  %p150_p0 = scmp.ne.s32.totalorder %s3254_s20, %s3250_s19 }
   0x6   : > { %p138_p1 = scmp.eq.s32.totalorder %s137_s26, 0  ;;  %p151_p2 = scmp.eq.s32.totalorder %s3311_s22, 1 }
   0x7   : > { %p156_p3 = scmp.ne.s32.totalorder %s3250_s19, %s3246_s18  ;;  %p157_p4 = scmp.eq.s32.totalorder %s2497_s23, 1 }
   0x8   : > { %s3326_s27 = scalar_select %p138_p1, %s3254_s20, %s140_s25  }
   0x9   : > { %p3328_p5 = por %p151_p2, %p150_p0  ;;  %p3332_p6 = por %p157_p4, %p156_p3 }
   0xa   : > { %p2500_p7 = scmp.ge.s32.totalorder %s3258_s21, 1  ;;  %p200_p8 = scmp.lt.s32.totalorder %s3258_s21, 3 }
   0xc   : > { %p201_p9 = pnand %p2500_p7, %p200_p8 }
   0xe   : > { %204 = sbr.rel (%p201_p9) target bundleno = 678 (0x2a6), region = 40 }
  0x13   : > { %p233_p10 = scmp.lt.s32.totalorder %s3311_s22, 1  ;;  %vm310_vm0 = vcmask 31744   ;;  %vm1837_vm1 = vcmask 64512   ;;  %vm2356_vm2 = vcmask 523264   ;;  %s230_s23 = sand.u32 1, %s3250_s19   ;;  %vm2405_vm3 = vcmask 1043456  }
  0x14   : > { %s2501_s25 = sshll.u32 %s230_s23, 3  ;;  %s3154_s26 = sshll.u32 %s3311_s22, 3 }
  0x15   : > { %s3340_s30 = scalar_select %p233_p10, %s3311_s22, 1 }
  0x16   : > { %s2421_s8 = scalar_lea.hbm %s4593_s5, %s3154_s26  ;;  %s232_s10 = scalar_lea.vmem [#allocation2], %s2501_s25 }
  0x17   : > { %s3155_s6 = smul.u32 432, %s3340_s30  ;;  %s2425_s12 = sshll.u32 %s2421_s8, 4  ;;  %s2426_s12 = int_to_ptr.hbm [resolvable:$true] %s2425_s12 }
  0x18   : > { %s3156_s7 = smul.u32 160, %s3340_s30  ;;  %s2423_s30 = sshll.u32 %s232_s10, 4  ;;  %s2424_s30 = int_to_ptr.vmem [resolvable:$true] %s2423_s30 }
  0x19   : > { %s3346_s9 = scalar_lea.vmem %s4588_s0, %s3155_s6  ;;  %s2410_s22 = scalar_lea.sflag [#allocation3], %s230_s23 }
  0x1a   : > { %v3349_v0 = vld [vmem:[%s3346_s9 + $0xb1] sm:$0xff]  ;;  %v3369_v4 = vld [vmem:[%s3346_s9 + $0xa9] sm:$0xff]  ;;  %v3389_v8 = vld [vmem:[%s3346_s9 + $0x99] sm:$0xff]  ;;  %s4174_s11 = scalar_lea.vmem %s4589_s1, %s3156_s7  ;;  %s3210_s13 = sshra.s32 %s2426_s12, 4  ;;  %s3211_s13 = int_to_ptr.hbm [resolvable:$true] %s3210_s13 }
  0x1b   : > { %v3352_v1 = vld [vmem:[%s3346_s9 + $0x171] sm:$0xff]  ;;  %2505 = vmatpush.xpose.msk.msra.mxu0 %vm310_vm0, %v3349_v0  ;;  %v3372_v5 = vld [vmem:[%s3346_s9 + $0x169] sm:$0xff]  ;;  %v3392_v9 = vld [vmem:[%s3346_s9 + $0x159] sm:$0xff]  ;;  %s3212_s14 = scalar_lea.hbm %s3211_s13, 8  ;;  %s3216_s15 = scalar_lea.hbm %s4593_s5, 16 }
  0x1c   : > { %v3355_v2 = vld [vmem:[%s3346_s9 + $0xb0] sm:$0xff]  ;;  %2522 = vmatpush.xpose.msk.msra.mxu1 %vm310_vm0, %v3352_v1  ;;  %v3375_v6 = vld [vmem:[%s3346_s9 + $0xa8] sm:$0xff]  ;;  %v3395_v10 = vld [vmem:[%s3346_s9 + $0x98] sm:$0xff]  ;;  %p3213_p11 = scmp.ne.s32.totalorder %s3211_s13, %s3212_s14  ;;  %p3217_p0 = scmp.lt.s32.totalorder %s3211_s13, %s4593_s5 }
  0x1d   : > { %4634 = vst [vmem:[#allocation5_spill] sm:$0xff] %v3355_v2  ;;  %v3362_v3 = vld [vmem:[%s3346_s9 + $0x170] sm:$0xff]  ;;  %2539 = vmatpush.xpose.msk.msra.mxu2 %vm310_vm0, %v3355_v2  ;;  %v3378_v7 = vld [vmem:[%s3346_s9 + $0x168] sm:$0xff]  ;;  %v3398_v11 = vld [vmem:[%s3346_s9 + $0x158] sm:$0xff]  ;;  %p3218_p1 = scmp.lt.s32.totalorder %s3216_s15, %s3212_s14 }
  0x1e   : > { %4635 = vst [vmem:[#allocation6_spill] sm:$0xff] %v3362_v3  ;;  %2556 = vmatpush.xpose.msk.msra.mxu3 %vm310_vm0, %v3362_v3  ;;  %v3409_v12 = vld [vmem:[%s3346_s9 + $0x91] sm:$0xff]  ;;  %v3429_v16 = vld [vmem:[%s3346_s9 + $0x81] sm:$0xff]  ;;  %v3449_v20 = vld [vmem:[%s3346_s9 + $0x79] sm:$0xff]  ;;  %p3214_p12 = pnand %p3213_p11, %p3328_p5 }
  0x1f   : > { %4636 = vst [vmem:[#allocation7_spill] sm:$0xff] %v3375_v6  ;;  %2506 = vmatpush.xpose.msk.msra.mxu0 %vm310_vm0, %v3369_v4  ;;  %v3412_v13 = vld [vmem:[%s3346_s9 + $0x151] sm:$0xff]  ;;  %v3432_v17 = vld [vmem:[%s3346_s9 + $0x141] sm:$0xff]  ;;  %v3452_v21 = vld [vmem:[%s3346_s9 + $0x139] sm:$0xff]  ;;  %p3219_p2 = por %p3218_p1, %p3217_p0 }
  0x20   : > { %4637 = vst [vmem:[#allocation8_spill] sm:$0xff] %v3378_v7  ;;  %2523 = vmatpush.xpose.msk.msra.mxu1 %vm310_vm0, %v3372_v5  ;;  %v3415_v14 = vld [vmem:[%s3346_s9 + $0x90] sm:$0xff]  ;;  %v3435_v18 = vld [vmem:[%s3346_s9 + $0x80] sm:$0xff]  ;;  %v3455_v22 = vld [vmem:[%s3346_s9 + $0x78] sm:$0xff]  ;;  %p3215_p13 = pneg %p3214_p12 }
  0x21   : > { %2540 = vmatpush.xpose.msk.msra.mxu2 %vm310_vm0, %v3375_v6  ;;  %4638 = vst [vmem:[#allocation9_spill] sm:$0xff] %v3395_v10  ;;  %v3418_v15 = vld [vmem:[%s3346_s9 + $0x150] sm:$0xff]  ;;  %v3438_v19 = vld [vmem:[%s3346_s9 + $0x140] sm:$0xff]  ;;  %v3458_v23 = vld [vmem:[%s3346_s9 + $0x138] sm:$0xff] }
  0x22   : > { %2557 = vmatpush.xpose.msk.msra.mxu3 %vm310_vm0, %v3378_v7  ;;  %4639 = vst [vmem:[#allocation10_spill] sm:$0xff] %v3398_v11  ;;  %v3469_v24 = vld [vmem:[%s3346_s9 + $0x69] sm:$0xff]  ;;  %v3489_v28 = vld [vmem:[%s3346_s9 + $0x61] sm:$0xff]  ;;  %v3509_v32 = vld [vmem:[%s3346_s9 + $0x51] sm:$0xff]  ;;  %p3220_p3 = pnand %p3219_p2, %p3215_p13 }
  0x23   : > { %2507 = vmatpush.xpose.msk.msra.mxu0 %vm310_vm0, %v3389_v8  ;;  %4640 = vst [vmem:[#allocation11_spill] sm:$0xff] %v3415_v14  ;;  %v3472_v25 = vld [vmem:[%s3346_s9 + $0x129] sm:$0xff]  ;;  %v3492_v29 = vld [vmem:[%s3346_s9 + $0x121] sm:$0xff]  ;;  %v3512_v33 = vld [vmem:[%s3346_s9 + $0x111] sm:$0xff] }
  0x24   : > { %2524 = vmatpush.xpose.msk.msra.mxu1 %vm310_vm0, %v3392_v9  ;;  %4641 = vst [vmem:[#allocation12_spill] sm:$0xff] %v3418_v15  ;;  %v3475_v26 = vld [vmem:[%s3346_s9 + $0x68] sm:$0xff]  ;;  %v3495_v30 = vld [vmem:[%s3346_s9 + $0x60] sm:$0xff]  ;;  %v3515_v34 = vld [vmem:[%s3346_s9 + $0x50] sm:$0xff] }
  0x25   : > { %2541 = vmatpush.xpose.msk.msra.mxu2 %vm310_vm0, %v3395_v10  ;;  %4642 = vst [vmem:[#allocation13_spill] sm:$0xff] %v3435_v18  ;;  %v3478_v27 = vld [vmem:[%s3346_s9 + $0x128] sm:$0xff]  ;;  %v3498_v31 = vld [vmem:[%s3346_s9 + $0x120] sm:$0xff]  ;;  %v3518_v35 = vld [vmem:[%s3346_s9 + $0x110] sm:$0xff] }
  0x26   : > { %2558 = vmatpush.xpose.msk.msra.mxu3 %vm310_vm0, %v3398_v11  ;;  %4643 = vst [vmem:[#allocation14_spill] sm:$0xff] %v3438_v19  ;;  %v3529_v36 = vld [vmem:[%s3346_s9 + $0x49] sm:$0xff]  ;;  %v3549_v40 = vld [vmem:[%s3346_s9 + $0x39] sm:$0xff]  ;;  %v3569_v44 = vld [vmem:[%s3346_s9 + $0x31] sm:$0xff] }
  0x27   : > { %2508 = vmatpush.xpose.msk.msra.mxu0 %vm310_vm0, %v3409_v12  ;;  %4644 = vst [vmem:[#allocation15_spill] sm:$0xff] %v3455_v22  ;;  %v3532_v37 = vld [vmem:[%s3346_s9 + $0x109] sm:$0xff]  ;;  %v3552_v41 = vld [vmem:[%s3346_s9 + $0xf9] sm:$0xff]  ;;  %v3572_v45 = vld [vmem:[%s3346_s9 + $0xf1] sm:$0xff] }
  0x28   : > { %2525 = vmatpush.xpose.msk.msra.mxu1 %vm310_vm0, %v3412_v13  ;;  %4645 = vst [vmem:[#allocation16_spill] sm:$0xff] %v3458_v23  ;;  %v3535_v38 = vld [vmem:[%s3346_s9 + $0x48] sm:$0xff]  ;;  %v3555_v42 = vld [vmem:[%s3346_s9 + $0x38] sm:$0xff]  ;;  %v3575_v46 = vld [vmem:[%s3346_s9 + $0x30] sm:$0xff] }
  0x29   : > { %2542 = vmatpush.xpose.msk.msra.mxu2 %vm310_vm0, %v3415_v14  ;;  %4646 = vst [vmem:[#allocation17_spill] sm:$0xff] %v3475_v26  ;;  %v3538_v39 = vld [vmem:[%s3346_s9 + $0x108] sm:$0xff]  ;;  %v3558_v43 = vld [vmem:[%s3346_s9 + $0xf8] sm:$0xff]  ;;  %v3578_v47 = vld [vmem:[%s3346_s9 + $0xf0] sm:$0xff] }
  0x2a   : > { %2559 = vmatpush.xpose.msk.msra.mxu3 %vm310_vm0, %v3418_v15  ;;  %4647 = vst [vmem:[#allocation18_spill] sm:$0xff] %v3478_v27  ;;  %v3589_v48 = vld [vmem:[%s3346_s9 + $0x21] sm:$0xff]  ;;  %v3609_v52 = vld [vmem:[%s3346_s9 + $0x19] sm:$0xff]  ;;  %v277_v56 = vld [vmem:[%s3346_s9 + $0x9] sm:$0xff] }
  0x2b   : > { %2509 = vmatpush.xpose.msk.msra.mxu0 %vm310_vm0, %v3429_v16  ;;  %4648 = vst [vmem:[#allocation19_spill] sm:$0xff] %v3495_v30  ;;  %v3592_v49 = vld [vmem:[%s3346_s9 + $0xe1] sm:$0xff]  ;;  %v3612_v53 = vld [vmem:[%s3346_s9 + $0xd9] sm:$0xff]  ;;  %v3630_v57 = vld [vmem:[%s3346_s9 + $0xc9] sm:$0xff] }
  0x2c   : > { %2526 = vmatpush.xpose.msk.msra.mxu1 %vm310_vm0, %v3432_v17  ;;  %4649 = vst [vmem:[#allocation20_spill] sm:$0xff] %v3498_v31  ;;  %v3595_v50 = vld [vmem:[%s3346_s9 + $0x20] sm:$0xff]  ;;  %v3615_v54 = vld [vmem:[%s3346_s9 + $0x18] sm:$0xff]  ;;  %v244_v58 = vld [vmem:[%s3346_s9 + $0x8] sm:$0xff] }
  0x2d   : > { %2543 = vmatpush.xpose.msk.msra.mxu2 %vm310_vm0, %v3435_v18  ;;  %4650 = vst [vmem:[#allocation21_spill] sm:$0xff] %v3515_v34  ;;  %v3598_v51 = vld [vmem:[%s3346_s9 + $0xe0] sm:$0xff]  ;;  %v3618_v55 = vld [vmem:[%s3346_s9 + $0xd8] sm:$0xff]  ;;  %v3634_v59 = vld [vmem:[%s3346_s9 + $0xc8] sm:$0xff] }
  0x2e   : > { %2560 = vmatpush.xpose.msk.msra.mxu3 %vm310_vm0, %v3438_v19  ;;  %4651 = vst [vmem:[#allocation22_spill] sm:$0xff] %v3518_v35  ;;  %v276_v60 = vld [vmem:[%s3346_s9 + $0x1] sm:$0xff] }
  0x2f   : > { %2510 = vmatpush.xpose.msk.msra.mxu0 %vm310_vm0, %v3449_v20  ;;  %4652 = vst [vmem:[#allocation23_spill] sm:$0xff] %v3535_v38  ;;  %v3644_v61 = vld [vmem:[%s3346_s9 + $0xc1] sm:$0xff] }
  0x30   : > { %2527 = vmatpush.xpose.msk.msra.mxu1 %vm310_vm0, %v3452_v21  ;;  %4653 = vst [vmem:[#allocation24_spill] sm:$0xff] %v3538_v39  ;;  %v243_v62 = vld [vmem:[%s3346_s9] sm:$0xff] }
  0x31   : > { %2544 = vmatpush.xpose.msk.msra.mxu2 %vm310_vm0, %v3455_v22  ;;  %4654 = vst [vmem:[#allocation25_spill] sm:$0xff] %v3555_v42  ;;  %v3648_v63 = vld [vmem:[%s3346_s9 + $0xc0] sm:$0xff] }
  0x32   : > { %2561 = vmatpush.xpose.msk.msra.mxu3 %vm310_vm0, %v3458_v23  ;;  %4655 = vst [vmem:[#allocation26_spill] sm:$0xff] %v3558_v43 }
  0x33   : > { %2511 = vmatpush.xpose.msk.msra.mxu0 %vm310_vm0, %v3469_v24  ;;  %4656 = vst [vmem:[#allocation27_spill] sm:$0xff] %v3575_v46 }
  0x34   : > { %2528 = vmatpush.xpose.msk.msra.mxu1 %vm310_vm0, %v3472_v25  ;;  %4657 = vst [vmem:[#allocation28_spill] sm:$0xff] %v3578_v47 }
  0x35   : > { %2545 = vmatpush.xpose.msk.msra.mxu2 %vm310_vm0, %v3475_v26  ;;  %4658 = vst [vmem:[#allocation29_spill] sm:$0xff] %v3589_v48 }
  0x36   : > { %2562 = vmatpush.xpose.msk.msra.mxu3 %vm310_vm0, %v3478_v27  ;;  %4659 = vst [vmem:[#allocation30_spill] sm:$0xff] %v3592_v49 }
  0x37   : > { %2512 = vmatpush.xpose.msk.msra.mxu0 %vm310_vm0, %v3489_v28  ;;  %4660 = vst [vmem:[#allocation31_spill] sm:$0xff] %v3609_v52 }
  0x38   : > { %2529 = vmatpush.xpose.msk.msra.mxu1 %vm310_vm0, %v3492_v29  ;;  %4661 = vst [vmem:[#allocation32_spill] sm:$0xff] %v3612_v53 }
  0x39   : > { %2546 = vmatpush.xpose.msk.msra.mxu2 %vm310_vm0, %v3495_v30  ;;  %4662 = vst [vmem:[#allocation33_spill] sm:$0xff] %v3634_v59 }
  0x3a   : > { %2563 = vmatpush.xpose.msk.msra.mxu3 %vm310_vm0, %v3498_v31  ;;  %4663 = vst [vmem:[#allocation34_spill] sm:$0xff] %v3648_v63 }
  0x3b   : > { %2513 = vmatpush.xpose.msk.msra.mxu0 %vm310_vm0, %v3509_v32 }
  0x3c   : > { %2530 = vmatpush.xpose.msk.msra.mxu1 %vm310_vm0, %v3512_v33 }
  0x3d   : > { %2547 = vmatpush.xpose.msk.msra.mxu2 %vm310_vm0, %v3515_v34 }
  0x3e   : > { %2564 = vmatpush.xpose.msk.msra.mxu3 %vm310_vm0, %v3518_v35 }
  0x3f   : > { %2514 = vmatpush.xpose.msk.msra.mxu0 %vm310_vm0, %v3529_v36 }
  0x40   : > { %2531 = vmatpush.xpose.msk.msra.mxu1 %vm310_vm0, %v3532_v37 }
  0x41   : > { %2548 = vmatpush.xpose.msk.msra.mxu2 %vm310_vm0, %v3535_v38 }
  0x42   : > { %2565 = vmatpush.xpose.msk.msra.mxu3 %vm310_vm0, %v3538_v39 }
  0x43   : > { %2515 = vmatpush.xpose.msk.msra.mxu0 %vm310_vm0, %v3549_v40 }
  0x44   : > { %2532 = vmatpush.xpose.msk.msra.mxu1 %vm310_vm0, %v3552_v41 }
  0x45   : > { %2549 = vmatpush.xpose.msk.msra.mxu2 %vm310_vm0, %v3555_v42 }
  0x46   : > { %2566 = vmatpush.xpose.msk.msra.mxu3 %vm310_vm0, %v3558_v43 }
  0x47   : > { %2516 = vmatpush.xpose.msk.msra.mxu0 %vm310_vm0, %v3569_v44 }
  0x48   : > { %2533 = vmatpush.xpose.msk.msra.mxu1 %vm310_vm0, %v3572_v45 }
  0x49   : > { %2550 = vmatpush.xpose.msk.msra.mxu2 %vm310_vm0, %v3575_v46 }
  0x4a   : > { %2567 = vmatpush.xpose.msk.msra.mxu3 %vm310_vm0, %v3578_v47 }
  0x4b   : > { %2517 = vmatpush.xpose.msk.msra.mxu0 %vm310_vm0, %v3589_v48  ;;  %v275_v48 = vld [vmem:[%s4590_s2] sm:$0xf] }
  0x4c   : > { %2534 = vmatpush.xpose.msk.msra.mxu1 %vm310_vm0, %v3592_v49  ;;  %v3736_v49 = vld [vmem:[%s3346_s9 + $0x13a] sm:$0xff] }
  0x4d   : > { %2551 = vmatpush.xpose.msk.msra.mxu2 %vm310_vm0, %v3595_v50 }
  0x4e   : > { %2568 = vmatpush.xpose.msk.msra.mxu3 %vm310_vm0, %v3598_v51 }
  0x4f   : > { %2518 = vmatpush.xpose.msk.msra.mxu0 %vm310_vm0, %v3609_v52  ;;  %v3680_v52 = vld [vmem:[%s3346_s9 + $0x180] sm:$0xff] }
  0x50   : > { %2535 = vmatpush.xpose.msk.msra.mxu1 %vm310_vm0, %v3612_v53  ;;  %v3651_v53 = vld [vmem:[%s3346_s9 + $0xb2] sm:$0xff]  ;;  %4665 = vst [vmem:[#allocation36_spill] sm:$0xff] %v3680_v52 }
  0x51   : > { %2552 = vmatpush.xpose.msk.msra.mxu2 %vm310_vm0, %v3615_v54 }
  0x52   : > { %2569 = vmatpush.xpose.msk.msra.mxu3 %vm310_vm0, %v3618_v55 }
  0x53   : > { %2519 = vmatpush.xpose.msk.msra.mxu0 %vm310_vm0, %v277_v56  ;;  %v3654_v56 = vld [vmem:[%s3346_s9 + $0x172] sm:$0xff] }
  0x54   : > { %2536 = vmatpush.xpose.msk.msra.mxu1 %vm310_vm0, %v3630_v57 }
  0x55   : > { %2553 = vmatpush.xpose.msk.msra.mxu2 %vm310_vm0, %v244_v58  ;;  %v3660_v58 = vld [vmem:[%s3346_s9 + $0x188] sm:$0xff] }
  0x56   : > { %2570 = vmatpush.xpose.msk.msra.mxu3 %vm310_vm0, %v3634_v59  ;;  %4664 = vst [vmem:[#allocation35_spill] sm:$0xff] %v3660_v58 }
  0x57   : > { %2520 = vmatpush.xpose.msk.msra.mxu0 %vm310_vm0, %v276_v60  ;;  %v3674_v60 = vld [vmem:[%s3346_s9 + $0xaa] sm:$0xff] }
  0x58   : > { %2537 = vmatpush.xpose.msk.msra.mxu1 %vm310_vm0, %v3644_v61 }
  0x59   : > { %2554 = vmatpush.xpose.msk.msra.mxu2 %vm310_vm0, %v243_v62  ;;  %v3677_v62 = vld [vmem:[%s3346_s9 + $0x16a] sm:$0xff] }
  0x5a   : > { %2571 = vmatpush.xpose.msk.msra.mxu3 %vm310_vm0, %v3648_v63 }
  0x5b   : > { %2574 = vmatpush.xpose.msk.msrb.mxu0 %vm310_vm0, %v3651_v53 }
  0x5c   : > { %2591 = vmatpush.xpose.msk.msrb.mxu1 %vm310_vm0, %v3654_v56  ;;  %2555 = vmatmul.msk.f32.vlgmr.msra.gmra.mxu2 %vm310_vm0, %v275_v48 }
  0x5d   : > { %2641 = vmatpush.xpose.msk.msrb.mxu2 %vm310_vm0, %v3634_v59  ;;  %v3694_v59 = vld [vmem:[%s3346_s9 + $0x15a] sm:$0xff]  ;;  %2572 = vmatmul.msk.f32.vlgmr.msra.gmra.mxu3 %vm310_vm0, %v275_v48  ;;  %v3788_v48 = vld [vmem:[%s3346_s9 + $0x112] sm:$0xff] }
  0x5e   : > { %2658 = vmatpush.xpose.msk.msrb.mxu3 %vm310_vm0, %v3660_v58  ;;  %v3691_v58 = vld [vmem:[%s3346_s9 + $0x9a] sm:$0xff] }
  0x5f   : > { %2575 = vmatpush.xpose.msk.msrb.mxu0 %vm310_vm0, %v3674_v60 }
  0x60   : > { %2592 = vmatpush.xpose.msk.msrb.mxu1 %vm310_vm0, %v3677_v62 }
  0x61   : > { %2642 = vmatpush.xpose.msk.msrb.mxu2 %vm310_vm0, %v3648_v63  ;;  %v3705_v63 = vld [vmem:[%s3346_s9 + $0x92] sm:$0xff] }
  0x62   : > { %2659 = vmatpush.xpose.msk.msrb.mxu3 %vm310_vm0, %v3680_v52  ;;  %v3708_v52 = vld [vmem:[%s3346_s9 + $0x152] sm:$0xff] }
  0x63   : > { %2576 = vmatpush.xpose.msk.msrb.mxu0 %vm310_vm0, %v3691_v58 }
  0x64   : > { %2593 = vmatpush.xpose.msk.msrb.mxu1 %vm310_vm0, %v3694_v59 }
  0x65   : > { %2643 = vmatpush.xpose.msk.msrb.mxu2 %vm310_vm0, %v3355_v2  ;;  %v3719_v2 = vld [vmem:[%s3346_s9 + $0x82] sm:$0xff] }
  0x66   : > { %2660 = vmatpush.xpose.msk.msrb.mxu3 %vm310_vm0, %v3362_v3  ;;  %v3722_v3 = vld [vmem:[%s3346_s9 + $0x142] sm:$0xff] }
  0x67   : > { %2577 = vmatpush.xpose.msk.msrb.mxu0 %vm310_vm0, %v3705_v63 }
  0x68   : > { %2594 = vmatpush.xpose.msk.msrb.mxu1 %vm310_vm0, %v3708_v52 }
  0x69   : > { %2644 = vmatpush.xpose.msk.msrb.mxu2 %vm310_vm0, %v3375_v6  ;;  %v3733_v6 = vld [vmem:[%s3346_s9 + $0x7a] sm:$0xff] }
  0x6a   : > { %2661 = vmatpush.xpose.msk.msrb.mxu3 %vm310_vm0, %v3378_v7  ;;  %v3743_v7 = vld [vmem:[%s3346_s9 + $0x6a] sm:$0xff] }
  0x6b   : > { %2578 = vmatpush.xpose.msk.msrb.mxu0 %vm310_vm0, %v3719_v2 }
  0x6c   : > { %2595 = vmatpush.xpose.msk.msrb.mxu1 %vm310_vm0, %v3722_v3 }
  0x6d   : > { %2645 = vmatpush.xpose.msk.msrb.mxu2 %vm310_vm0, %v3395_v10  ;;  %v2504_v10 = vld [vmem:[%s4590_s2 + $0x4] sm:$0xf] }
  0x6e   : > { %2662 = vmatpush.xpose.msk.msrb.mxu3 %vm310_vm0, %v3398_v11  ;;  %v3750_v11 = vld [vmem:[%s3346_s9 + $0x12a] sm:$0xff]  ;;  %2521 = vmatmul.msk.f32.vlgmr.msra.gmra.mxu0 %vm310_vm0, %v2504_v10 }
  0x6f   : > { %2579 = vmatpush.xpose.msk.msrb.mxu0 %vm310_vm0, %v3733_v6  ;;  %2538 = vmatmul.msk.f32.vlgmr.msra.gmra.mxu1 %vm310_vm0, %v2504_v10  ;;  %v3785_v10 = vld [vmem:[%s3346_s9 + $0x52] sm:$0xff] }
  0x70   : > { %2596 = vmatpush.xpose.msk.msrb.mxu1 %vm310_vm0, %v3736_v49 }
  0x71   : > { %2646 = vmatpush.xpose.msk.msrb.mxu2 %vm310_vm0, %v3415_v14  ;;  %v3774_v14 = vld [vmem:[%s3346_s9 + $0x122] sm:$0xff] }
  0x72   : > { %2663 = vmatpush.xpose.msk.msrb.mxu3 %vm310_vm0, %v3418_v15  ;;  %v3771_v15 = vld [vmem:[%s3346_s9 + $0x62] sm:$0xff] }
  0x73   : > { %2580 = vmatpush.xpose.msk.msrb.mxu0 %vm310_vm0, %v3743_v7 }
  0x74   : > { %2597 = vmatpush.xpose.msk.msrb.mxu1 %vm310_vm0, %v3750_v11 }
  0x75   : > { %2647 = vmatpush.xpose.msk.msrb.mxu2 %vm310_vm0, %v3435_v18  ;;  %v2640_v18 = vld [vmem:[%s4590_s2 + $0xc] sm:$0xf] }
  0x76   : > { %2664 = vmatpush.xpose.msk.msrb.mxu3 %vm310_vm0, %v3438_v19  ;;  %v3870_v19 = vld [vmem:[%s3346_s9 + $0xca] sm:$0xff] }
  0x77   : > { %2581 = vmatpush.xpose.msk.msrb.mxu0 %vm310_vm0, %v3771_v15 }
  0x78   : > { %2598 = vmatpush.xpose.msk.msrb.mxu1 %vm310_vm0, %v3774_v14 }
  0x79   : > { %2648 = vmatpush.xpose.msk.msrb.mxu2 %vm310_vm0, %v3455_v22  ;;  %v3799_v22 = vld [vmem:[%s3346_s9 + $0x4a] sm:$0xff] }
  0x7a   : > { %2665 = vmatpush.xpose.msk.msrb.mxu3 %vm310_vm0, %v3458_v23  ;;  %v3802_v23 = vld [vmem:[%s3346_s9 + $0x10a] sm:$0xff] }
  0x7b   : > { %2582 = vmatpush.xpose.msk.msrb.mxu0 %vm310_vm0, %v3785_v10 }
  0x7c   : > { %2599 = vmatpush.xpose.msk.msrb.mxu1 %vm310_vm0, %v3788_v48 }
  0x7d   : > { %2649 = vmatpush.xpose.msk.msrb.mxu2 %vm310_vm0, %v3475_v26  ;;  %v3813_v26 = vld [vmem:[%s3346_s9 + $0x3a] sm:$0xff] }
  0x7e   : > { %2666 = vmatpush.xpose.msk.msrb.mxu3 %vm310_vm0, %v3478_v27  ;;  %4666 = vst [vmem:[#allocation37_spill] sm:$0xff] %v3813_v26  ;;  %v3816_v27 = vld [vmem:[%s3346_s9 + $0xfa] sm:$0xff] }
  0x7f   : > { %2583 = vmatpush.xpose.msk.msrb.mxu0 %vm310_vm0, %v3799_v22  ;;  %4667 = vst [vmem:[#allocation38_spill] sm:$0xff] %v3816_v27 }
  0x80   : > { %2600 = vmatpush.xpose.msk.msrb.mxu1 %vm310_vm0, %v3802_v23 }
  0x81   : > { %2650 = vmatpush.xpose.msk.msrb.mxu2 %vm310_vm0, %v3495_v30  ;;  %v3827_v30 = vld [vmem:[%s3346_s9 + $0x32] sm:$0xff] }
  0x82   : > { %2667 = vmatpush.xpose.msk.msrb.mxu3 %vm310_vm0, %v3498_v31  ;;  %4668 = vst [vmem:[#allocation39_spill] sm:$0xff] %v3827_v30  ;;  %v3830_v31 = vld [vmem:[%s3346_s9 + $0xf2] sm:$0xff] }
  0x83   : > { %2584 = vmatpush.xpose.msk.msrb.mxu0 %vm310_vm0, %v3813_v26  ;;  %4669 = vst [vmem:[#allocation40_spill] sm:$0xff] %v3830_v31 }
  0x84   : > { %2601 = vmatpush.xpose.msk.msrb.mxu1 %vm310_vm0, %v3816_v27 }
  0x85   : > { %2651 = vmatpush.xpose.msk.msrb.mxu2 %vm310_vm0, %v3515_v34  ;;  %v3841_v34 = vld [vmem:[%s3346_s9 + $0x22] sm:$0xff] }
  0x86   : > { %2668 = vmatpush.xpose.msk.msrb.mxu3 %vm310_vm0, %v3518_v35  ;;  %v3844_v35 = vld [vmem:[%s3346_s9 + $0xe2] sm:$0xff] }
  0x87   : > { %2585 = vmatpush.xpose.msk.msrb.mxu0 %vm310_vm0, %v3827_v30 }
  0x88   : > { %2602 = vmatpush.xpose.msk.msrb.mxu1 %vm310_vm0, %v3830_v31 }
  0x89   : > { %2652 = vmatpush.xpose.msk.msrb.mxu2 %vm310_vm0, %v3535_v38  ;;  %v3858_v38 = vld [vmem:[%s3346_s9 + $0xda] sm:$0xff] }
  0x8a   : > { %2669 = vmatpush.xpose.msk.msrb.mxu3 %vm310_vm0, %v3538_v39  ;;  %v3855_v39 = vld [vmem:[%s3346_s9 + $0x1a] sm:$0xff] }
  0x8b   : > { %2586 = vmatpush.xpose.msk.msrb.mxu0 %vm310_vm0, %v3841_v34 }
  0x8c   : > { %2603 = vmatpush.xpose.msk.msrb.mxu1 %vm310_vm0, %v3844_v35 }
  0x8d   : > { %2653 = vmatpush.xpose.msk.msrb.mxu2 %vm310_vm0, %v3555_v42  ;;  %v590_v42 = vld [vmem:[%s3346_s9 + $0xa] sm:$0xff] }
  0x8e   : > { %2670 = vmatpush.xpose.msk.msrb.mxu3 %vm310_vm0, %v3558_v43  ;;  %v589_v43 = vld [vmem:[%s3346_s9 + $0x2] sm:$0xff] }
  0x8f   : > { %2587 = vmatpush.xpose.msk.msrb.mxu0 %vm310_vm0, %v3855_v39 }
  0x90   : > { %2604 = vmatpush.xpose.msk.msrb.mxu1 %vm310_vm0, %v3858_v38 }
  0x91   : > { %2654 = vmatpush.xpose.msk.msrb.mxu2 %vm310_vm0, %v3575_v46  ;;  %v3881_v46 = vld [vmem:[%s3346_s9 + $0xc2] sm:$0xff] }
  0x92   : > { %2671 = vmatpush.xpose.msk.msrb.mxu3 %vm310_vm0, %v3578_v47  ;;  %v3884_v47 = vld [vmem:[%s3346_s9 + $0x189] sm:$0xff] }
  0x93   : > { %2588 = vmatpush.xpose.msk.msrb.mxu0 %vm310_vm0, %v590_v42  ;;  %v3890_v42 = vld [vmem:[%s3346_s9 + $0x18a] sm:$0xff] }
  0x94   : > { %2605 = vmatpush.xpose.msk.msrb.mxu1 %vm310_vm0, %v3870_v19 }
  0x95   : > { %2655 = vmatpush.xpose.msk.msrb.mxu2 %vm310_vm0, %v3595_v50  ;;  %v2573_v50 = vld [vmem:[%s4590_s2 + $0x8] sm:$0xf] }
  0x96   : > { %2672 = vmatpush.xpose.msk.msrb.mxu3 %vm310_vm0, %v3598_v51 }
  0x97   : > { %2589 = vmatpush.xpose.msk.msrb.mxu0 %vm310_vm0, %v589_v43  ;;  %v3911_v43 = vld [vmem:[%s3346_s9 + $0x181] sm:$0xff] }
  0x98   : > { %2606 = vmatpush.xpose.msk.msrb.mxu1 %vm310_vm0, %v3881_v46 }
  0x99   : > { %2656 = vmatpush.xpose.msk.msrb.mxu2 %vm310_vm0, %v3615_v54  ;;  %v3916_v54 = vld [vmem:[%s3346_s9 + $0x182] sm:$0xff] }
  0x9a   : > { %2673 = vmatpush.xpose.msk.msrb.mxu3 %vm310_vm0, %v3618_v55  ;;  %2590 = vmatmul.msk.f32.vlgmr.msrb.gmra.mxu0 %vm310_vm0, %v2573_v50 }
  0x9b   : > { %2708 = vmatpush.xpose.msk.msra.mxu0 %vm310_vm0, %v3630_v57  ;;  %2607 = vmatmul.msk.f32.vlgmr.msrb.gmra.mxu1 %vm310_vm0, %v2573_v50  ;;  %v4671_v50 = vld [vmem:[#allocation30_spill] sm:$0xff] }
  0x9c   : > { %2725 = vmatpush.xpose.msk.msra.mxu1 %vm310_vm0, %v3884_v47  ;;  %2657 = vmatmul.msk.f32.vlgmr.msrb.gmra.mxu2 %vm310_vm0, %v2640_v18 }
  0x9d   : > { %2775 = vmatpush.xpose.msk.msra.mxu2 %vm310_vm0, %v3870_v19  ;;  %2674 = vmatmul.msk.f32.vlgmr.msrb.gmra.mxu3 %vm310_vm0, %v2640_v18  ;;  %v4670_v18 = vld [vmem:[#allocation29_spill] sm:$0xff] }
  0x9e   : > { %2792 = vmatpush.xpose.msk.msra.mxu3 %vm310_vm0, %v3890_v42 }
  0x9f   : > { %2709 = vmatpush.xpose.msk.msra.mxu0 %vm310_vm0, %v3644_v61 }
  0xa0   : > { %2726 = vmatpush.xpose.msk.msra.mxu1 %vm310_vm0, %v3911_v43 }
  0xa1   : > { %2776 = vmatpush.xpose.msk.msra.mxu2 %vm310_vm0, %v3881_v46 }
  0xa2   : > { %2793 = vmatpush.xpose.msk.msra.mxu3 %vm310_vm0, %v3916_v54 }
  0xa3   : > { %2710 = vmatpush.xpose.msk.msra.mxu0 %vm310_vm0, %v3349_v0 }
  0xa4   : > { %2727 = vmatpush.xpose.msk.msra.mxu1 %vm310_vm0, %v3352_v1 }
  0xa5   : > { %2777 = vmatpush.xpose.msk.msra.mxu2 %vm310_vm0, %v3651_v53 }
  0xa6   : > { %2794 = vmatpush.xpose.msk.msra.mxu3 %vm310_vm0, %v3654_v56 }
  0xa7   : > { %2711 = vmatpush.xpose.msk.msra.mxu0 %vm310_vm0, %v3369_v4 }
  0xa8   : > { %2728 = vmatpush.xpose.msk.msra.mxu1 %vm310_vm0, %v3372_v5 }
  0xa9   : > { %2778 = vmatpush.xpose.msk.msra.mxu2 %vm310_vm0, %v3674_v60 }
  0xaa   : > { %2795 = vmatpush.xpose.msk.msra.mxu3 %vm310_vm0, %v3677_v62 }
  0xab   : > { %2712 = vmatpush.xpose.msk.msra.mxu0 %vm310_vm0, %v3389_v8 }
  0xac   : > { %2729 = vmatpush.xpose.msk.msra.mxu1 %vm310_vm0, %v3392_v9 }
  0xad   : > { %2779 = vmatpush.xpose.msk.msra.mxu2 %vm310_vm0, %v3691_v58 }
  0xae   : > { %2796 = vmatpush.xpose.msk.msra.mxu3 %vm310_vm0, %v3694_v59 }
  0xaf   : > { %2713 = vmatpush.xpose.msk.msra.mxu0 %vm310_vm0, %v3409_v12 }
  0xb0   : > { %2730 = vmatpush.xpose.msk.msra.mxu1 %vm310_vm0, %v3412_v13 }
  0xb1   : > { %2780 = vmatpush.xpose.msk.msra.mxu2 %vm310_vm0, %v3705_v63 }
  0xb2   : > { %2797 = vmatpush.xpose.msk.msra.mxu3 %vm310_vm0, %v3708_v52 }
  0xb3   : > { %2714 = vmatpush.xpose.msk.msra.mxu0 %vm310_vm0, %v3429_v16 }
  0xb4   : > { %2731 = vmatpush.xpose.msk.msra.mxu1 %vm310_vm0, %v3432_v17 }
  0xb5   : > { %2781 = vmatpush.xpose.msk.msra.mxu2 %vm310_vm0, %v3719_v2 }
  0xb6   : > { %2798 = vmatpush.xpose.msk.msra.mxu3 %vm310_vm0, %v3722_v3 }
  0xb7   : > { %2715 = vmatpush.xpose.msk.msra.mxu0 %vm310_vm0, %v3449_v20 }
  0xb8   : > { %2732 = vmatpush.xpose.msk.msra.mxu1 %vm310_vm0, %v3452_v21 }
  0xb9   : > { %2782 = vmatpush.xpose.msk.msra.mxu2 %vm310_vm0, %v3733_v6 }
  0xba   : > { %2799 = vmatpush.xpose.msk.msra.mxu3 %vm310_vm0, %v3736_v49 }
  0xbb   : > { %2716 = vmatpush.xpose.msk.msra.mxu0 %vm310_vm0, %v3469_v24 }
  0xbc   : > { %2733 = vmatpush.xpose.msk.msra.mxu1 %vm310_vm0, %v3472_v25 }
  0xbd   : > { %2783 = vmatpush.xpose.msk.msra.mxu2 %vm310_vm0, %v3743_v7 }
  0xbe   : > { %2800 = vmatpush.xpose.msk.msra.mxu3 %vm310_vm0, %v3750_v11 }
  0xbf   : > { %2717 = vmatpush.xpose.msk.msra.mxu0 %vm310_vm0, %v3489_v28 }
  0xc0   : > { %2734 = vmatpush.xpose.msk.msra.mxu1 %vm310_vm0, %v3492_v29 }
  0xc1   : > { %2784 = vmatpush.xpose.msk.msra.mxu2 %vm310_vm0, %v3771_v15 }
  0xc2   : > { %2801 = vmatpush.xpose.msk.msra.mxu3 %vm310_vm0, %v3774_v14 }
  0xc3   : > { %2718 = vmatpush.xpose.msk.msra.mxu0 %vm310_vm0, %v3509_v32 }
  0xc4   : > { %2735 = vmatpush.xpose.msk.msra.mxu1 %vm310_vm0, %v3512_v33 }
  0xc5   : > { %2785 = vmatpush.xpose.msk.msra.mxu2 %vm310_vm0, %v3785_v10 }
  0xc6   : > { %2802 = vmatpush.xpose.msk.msra.mxu3 %vm310_vm0, %v3788_v48 }
  0xc7   : > { %2719 = vmatpush.xpose.msk.msra.mxu0 %vm310_vm0, %v3529_v36 }
  0xc8   : > { %2736 = vmatpush.xpose.msk.msra.mxu1 %vm310_vm0, %v3532_v37 }
  0xc9   : > { %2786 = vmatpush.xpose.msk.msra.mxu2 %vm310_vm0, %v3799_v22 }
  0xca   : > { %2803 = vmatpush.xpose.msk.msra.mxu3 %vm310_vm0, %v3802_v23 }
  0xcb   : > { %2720 = vmatpush.xpose.msk.msra.mxu0 %vm310_vm0, %v3549_v40 }
  0xcc   : > { %2737 = vmatpush.xpose.msk.msra.mxu1 %vm310_vm0, %v3552_v41 }
  0xcd   : > { %2787 = vmatpush.xpose.msk.msra.mxu2 %vm310_vm0, %v3813_v26  ;;  %v4672_v26 = vld [vmem:[#allocation31_spill] sm:$0xff] }
  0xce   : > { %2804 = vmatpush.xpose.msk.msra.mxu3 %vm310_vm0, %v3816_v27  ;;  %v2840_v27 = vld [vmem:[%s3346_s9 + $0x1a0] sm:$0xff] }
  0xcf   : > { %2721 = vmatpush.xpose.msk.msra.mxu0 %vm310_vm0, %v3569_v44 }
  0xd0   : > { %2738 = vmatpush.xpose.msk.msra.mxu1 %vm310_vm0, %v3572_v45 }
  0xd1   : > { %2788 = vmatpush.xpose.msk.msra.mxu2 %vm310_vm0, %v3827_v30  ;;  %v4673_v30 = vld [vmem:[#allocation32_spill] sm:$0xff] }
  0xd2   : > { %2805 = vmatpush.xpose.msk.msra.mxu3 %vm310_vm0, %v3830_v31  ;;  %v2907_v31 = vld [vmem:[%s3346_s9 + $0x1a1] sm:$0xff] }
  0xd3   : > { %2722 = vmatpush.xpose.msk.msra.mxu0 %vm310_vm0, %v4670_v18  ;;  %v2906_v18 = vld [vmem:[%s3346_s9 + $0x199] sm:$0xff] }
  0xd4   : > { %2739 = vmatpush.xpose.msk.msra.mxu1 %vm310_vm0, %v4671_v50 }
  0xd5   : > { %2789 = vmatpush.xpose.msk.msra.mxu2 %vm310_vm0, %v3841_v34  ;;  %v2707_v34 = vld [vmem:[%s4590_s2 + $0x10] sm:$0xf] }
  0xd6   : > { %2806 = vmatpush.xpose.msk.msra.mxu3 %vm310_vm0, %v3844_v35 }
  0xd7   : > { %2723 = vmatpush.xpose.msk.msra.mxu0 %vm310_vm0, %v4672_v26  ;;  %v2774_v26 = vld [vmem:[%s4590_s2 + $0x14] sm:$0xf] }
  0xd8   : > { %2740 = vmatpush.xpose.msk.msra.mxu1 %vm310_vm0, %v4673_v30 }
  0xd9   : > { %2790 = vmatpush.xpose.msk.msra.mxu2 %vm310_vm0, %v3855_v39  ;;  %v2839_v39 = vld [vmem:[%s3346_s9 + $0x198] sm:$0xff] }
  0xda   : > { %2807 = vmatpush.xpose.msk.msra.mxu3 %vm310_vm0, %v3858_v38  ;;  %2724 = vmatmul.msk.f32.vlgmr.msra.gmra.mxu0 %vm310_vm0, %v2707_v34 }
  0xdb   : > { %2842 = vmatpush.xpose.msk.msrb.mxu0 %vm310_vm0, %v3598_v51  ;;  %2741 = vmatmul.msk.f32.vlgmr.msra.gmra.mxu1 %vm310_vm0, %v2707_v34  ;;  %v4676_v51 = vld [vmem:[#allocation34_spill] sm:$0xff] }
  0xdc   : > { %2859 = vmatpush.xpose.msk.msrb.mxu1 %vm310_vm0, %v2840_v27  ;;  %2791 = vmatmul.msk.f32.vlgmr.msra.gmra.mxu2 %vm310_vm0, %v2774_v26  ;;  %v4674_v27 = vld [vmem:[#allocation33_spill] sm:$0xff] }
  0xdd   : > { %2909 = vmatpush.xpose.msk.msrb.mxu2 %vm310_vm0, %v4671_v50  ;;  %2808 = vmatmul.msk.f32.vlgmr.msra.gmra.mxu3 %vm310_vm0, %v2774_v26  ;;  %v4679_v50 = vld [vmem:[#allocation6_spill] sm:$0xff]  ;;  %v4688_v26 = vld [vmem:[#allocation15_spill] sm:$0xff] }
  0xde   : > { %2926 = vmatpush.xpose.msk.msrb.mxu3 %vm310_vm0, %v2907_v31  ;;  %v4675_v31 = vld [vmem:[#allocation35_spill] sm:$0xff] }
  0xdf   : > { %2843 = vmatpush.xpose.msk.msrb.mxu0 %vm310_vm0, %v3618_v55  ;;  %v4677_v55 = vld [vmem:[#allocation36_spill] sm:$0xff] }
  0xe0   : > { %2860 = vmatpush.xpose.msk.msrb.mxu1 %vm310_vm0, %v2839_v39  ;;  %v586_v39 = vpop.f32.mrf.mxu3 }
  0xe1   : > { %2910 = vmatpush.xpose.msk.msrb.mxu2 %vm310_vm0, %v4673_v30  ;;  %v4678_v30 = vld [vmem:[#allocation5_spill] sm:$0xff] }
  0xe2   : > { %2927 = vmatpush.xpose.msk.msrb.mxu3 %vm310_vm0, %v2906_v18  ;;  %v4696_v18 = vld [vmem:[#allocation23_spill] sm:$0xff] }
  0xe3   : > { %2844 = vmatpush.xpose.msk.msrb.mxu0 %vm310_vm0, %v4674_v27  ;;  %v4701_v27 = vld [vmem:[#allocation28_spill] sm:$0xff] }
  0xe4   : > { %2861 = vmatpush.xpose.msk.msrb.mxu1 %vm310_vm0, %v4675_v31  ;;  %v2908_v31 = vld [vmem:[%s4590_s2 + $0x1c] sm:$0xf] }
  0xe5   : > { %2911 = vmatpush.xpose.msk.msrb.mxu2 %vm310_vm0, %v3630_v57  ;;  %v4681_v57 = vld [vmem:[#allocation8_spill] sm:$0xff] }
  0xe6   : > { %2928 = vmatpush.xpose.msk.msrb.mxu3 %vm310_vm0, %v3884_v47  ;;  %v4680_v47 = vld [vmem:[#allocation7_spill] sm:$0xff] }
  0xe7   : > { %2845 = vmatpush.xpose.msk.msrb.mxu0 %vm310_vm0, %v4676_v51  ;;  %v4207_v51 = vld [vmem:[%s4174_s11 + $0x61] sm:$0xff] }
  0xe8   : > { %2862 = vmatpush.xpose.msk.msrb.mxu1 %vm310_vm0, %v4677_v55 }
  0xe9   : > { %2912 = vmatpush.xpose.msk.msrb.mxu2 %vm310_vm0, %v3644_v61  ;;  %v4682_v61 = vld [vmem:[#allocation9_spill] sm:$0xff] }
  0xea   : > { %2929 = vmatpush.xpose.msk.msrb.mxu3 %vm310_vm0, %v3911_v43  ;;  %v4683_v43 = vld [vmem:[#allocation10_spill] sm:$0xff] }
  0xeb   : > { %2846 = vmatpush.xpose.msk.msrb.mxu0 %vm310_vm0, %v4678_v30 }
  0xec   : > { %2863 = vmatpush.xpose.msk.msrb.mxu1 %vm310_vm0, %v4679_v50  ;;  %v4218_v50 = vld [vmem:[%s4174_s11 + $0x60] sm:$0xff] }
  0xed   : > { %2913 = vmatpush.xpose.msk.msrb.mxu2 %vm310_vm0, %v3349_v0  ;;  %v4684_v0 = vld [vmem:[#allocation11_spill] sm:$0xff] }
  0xee   : > { %2930 = vmatpush.xpose.msk.msrb.mxu3 %vm310_vm0, %v3352_v1  ;;  %v4685_v1 = vld [vmem:[#allocation12_spill] sm:$0xff] }
  0xef   : > { %2847 = vmatpush.xpose.msk.msrb.mxu0 %vm310_vm0, %v4680_v47 }
  0xf0   : > { %2864 = vmatpush.xpose.msk.msrb.mxu1 %vm310_vm0, %v4681_v57  ;;  %v4221_v57 = vld [vmem:[%s4174_s11 + $0x51] sm:$0xff] }
  0xf1   : > { %2914 = vmatpush.xpose.msk.msrb.mxu2 %vm310_vm0, %v3369_v4  ;;  %v4686_v4 = vld [vmem:[#allocation13_spill] sm:$0xff] }
  0xf2   : > { %2931 = vmatpush.xpose.msk.msrb.mxu3 %vm310_vm0, %v3372_v5  ;;  %v4687_v5 = vld [vmem:[#allocation14_spill] sm:$0xff] }
  0xf3   : > { %2848 = vmatpush.xpose.msk.msrb.mxu0 %vm310_vm0, %v4682_v61  ;;  %v4232_v61 = vld [vmem:[%s4174_s11 + $0x50] sm:$0xff] }
  0xf4   : > { %2865 = vmatpush.xpose.msk.msrb.mxu1 %vm310_vm0, %v4683_v43 }
  0xf5   : > { %2915 = vmatpush.xpose.msk.msrb.mxu2 %vm310_vm0, %v3389_v8  ;;  %v427_v8 = vpop.f32.mrf.mxu0 }
  0xf6   : > { %2932 = vmatpush.xpose.msk.msrb.mxu3 %vm310_vm0, %v3392_v9  ;;  %v566_v9 = vpop.f32.mrf.mxu2 }
  0xf7   : > { %2849 = vmatpush.xpose.msk.msrb.mxu0 %vm310_vm0, %v4684_v0  ;;  %v567_v34 = vadd.f32 %v566_v9, %v427_v8  ;;  %v4237_v0 = vld [vmem:[%s4174_s11 + $0x41] sm:$0xff]  ;;  %v4324_v9 = vld [vmem:[%s4174_s11 + $0x52] sm:$0xff] }
  0xf8   : > { %2866 = vmatpush.xpose.msk.msrb.mxu1 %vm310_vm0, %v4685_v1  ;;  %v4307_v8 = vld [vmem:[%s4174_s11 + $0x62] sm:$0xff] }
  0xf9   : > { %2916 = vmatpush.xpose.msk.msrb.mxu2 %vm310_vm0, %v3409_v12  ;;  %v4689_v12 = vld [vmem:[#allocation16_spill] sm:$0xff] }
  0xfa   : > { %2933 = vmatpush.xpose.msk.msrb.mxu3 %vm310_vm0, %v3412_v13  ;;  %v4690_v13 = vld [vmem:[#allocation17_spill] sm:$0xff] }
  0xfb   : > { %2850 = vmatpush.xpose.msk.msrb.mxu0 %vm310_vm0, %v4686_v4 }
  0xfc   : > { %2867 = vmatpush.xpose.msk.msrb.mxu1 %vm310_vm0, %v4687_v5  ;;  %v4294_v5 = vld [vmem:[%s4174_s11 + $0x72] sm:$0xff] }
  0xfd   : > { %2917 = vmatpush.xpose.msk.msrb.mxu2 %vm310_vm0, %v3429_v16  ;;  %v4691_v16 = vld [vmem:[#allocation18_spill] sm:$0xff] }
  0xfe   : > { %2934 = vmatpush.xpose.msk.msrb.mxu3 %vm310_vm0, %v3432_v17  ;;  %v4692_v17 = vld [vmem:[#allocation19_spill] sm:$0xff] }
  0xff   : > { %2851 = vmatpush.xpose.msk.msrb.mxu0 %vm310_vm0, %v4688_v26  ;;  %v4705_v26 = vld [vmem:[#allocation40_spill] sm:$0xff] }
 0x100   : > { %2868 = vmatpush.xpose.msk.msrb.mxu1 %vm310_vm0, %v4689_v12  ;;  %v3029_v12 = vld [vmem:[%s4591_s3 + $0x8] sm:$0xf] }
 0x101   : > { %2918 = vmatpush.xpose.msk.msrb.mxu2 %vm310_vm0, %v3449_v20  ;;  %v4693_v20 = vld [vmem:[#allocation20_spill] sm:$0xff] }
 0x102   : > { %2935 = vmatpush.xpose.msk.msrb.mxu3 %vm310_vm0, %v3452_v21  ;;  %v4694_v21 = vld [vmem:[#allocation21_spill] sm:$0xff] }
 0x103   : > { %2852 = vmatpush.xpose.msk.msrb.mxu0 %vm310_vm0, %v4690_v13  ;;  %v3047_v13 = vld [vmem:[%s4591_s3 + $0xc] sm:$0xf] }
 0x104   : > { %2869 = vmatpush.xpose.msk.msrb.mxu1 %vm310_vm0, %v4691_v16 }
 0x105   : > { %2919 = vmatpush.xpose.msk.msrb.mxu2 %vm310_vm0, %v3469_v24  ;;  %v4695_v24 = vld [vmem:[#allocation22_spill] sm:$0xff] }
 0x106   : > { %2936 = vmatpush.xpose.msk.msrb.mxu3 %vm310_vm0, %v3472_v25  ;;  %v447_v25 = vpop.f32.mrf.mxu1 }
 0x107   : > { %2853 = vmatpush.xpose.msk.msrb.mxu0 %vm310_vm0, %v4692_v17 }
 0x108   : > { %2870 = vmatpush.xpose.msk.msrb.mxu1 %vm310_vm0, %v4693_v20 }
 0x109   : > { %2920 = vmatpush.xpose.msk.msrb.mxu2 %vm310_vm0, %v3489_v28  ;;  %v4697_v28 = vld [vmem:[#allocation24_spill] sm:$0xff] }
 0x10a   : > { %2937 = vmatpush.xpose.msk.msrb.mxu3 %vm310_vm0, %v3492_v29  ;;  %v587_v29 = vadd.f32 %v586_v39, %v447_v25 }
 0x10b   : > { %2854 = vmatpush.xpose.msk.msrb.mxu0 %vm310_vm0, %v4694_v21 }
 0x10c   : > { %2871 = vmatpush.xpose.msk.msrb.mxu1 %vm310_vm0, %v4695_v24 }
 0x10d   : > { %2921 = vmatpush.xpose.msk.msrb.mxu2 %vm310_vm0, %v3509_v32  ;;  %v4698_v32 = vld [vmem:[#allocation25_spill] sm:$0xff] }
 0x10e   : > { %2938 = vmatpush.xpose.msk.msrb.mxu3 %vm310_vm0, %v3512_v33  ;;  %v4699_v33 = vld [vmem:[#allocation26_spill] sm:$0xff] }
 0x10f   : > { %2855 = vmatpush.xpose.msk.msrb.mxu0 %vm310_vm0, %v4696_v18 }
 0x110   : > { %2872 = vmatpush.xpose.msk.msrb.mxu1 %vm310_vm0, %v4697_v28  ;;  %v3101_v28 = vld [vmem:[%s4591_s3 + $0x18] sm:$0xf] }
 0x111   : > { %2922 = vmatpush.xpose.msk.msrb.mxu2 %vm310_vm0, %v3529_v36  ;;  %v2974_v36 = vld [vmem:[%s3346_s9 + $0x1a2] sm:$0xff] }
 0x112   : > { %2939 = vmatpush.xpose.msk.msrb.mxu3 %vm310_vm0, %v3532_v37  ;;  %v4700_v37 = vld [vmem:[#allocation27_spill] sm:$0xff] }
 0x113   : > { %2856 = vmatpush.xpose.msk.msrb.mxu0 %vm310_vm0, %v4698_v32  ;;  %v3065_v32 = vld [vmem:[%s4591_s3 + $0x10] sm:$0xf] }
 0x114   : > { %2873 = vmatpush.xpose.msk.msrb.mxu1 %vm310_vm0, %v4699_v33  ;;  %v3119_v33 = vld [vmem:[%s4591_s3 + $0x1c] sm:$0xf] }
 0x115   : > { %2923 = vmatpush.xpose.msk.msrb.mxu2 %vm310_vm0, %v3549_v40  ;;  %v4182_v40 = vld [vmem:[%s4174_s11 + $0x71] sm:$0xff] }
 0x116   : > { %2940 = vmatpush.xpose.msk.msrb.mxu3 %vm310_vm0, %v3552_v41  ;;  %v2841_v41 = vld [vmem:[%s4590_s2 + $0x18] sm:$0xf] }
 0x117   : > { %2857 = vmatpush.xpose.msk.msrb.mxu0 %vm310_vm0, %v4700_v37  ;;  %v3137_v37 = vld [vmem:[%s4591_s3 + $0x20] sm:$0xf] }
 0x118   : > { %2874 = vmatpush.xpose.msk.msrb.mxu1 %vm310_vm0, %v4701_v27  ;;  %v759_v30 = vpop.f32.mrf.mxu1 }
 0x119   : > { %2924 = vmatpush.xpose.msk.msrb.mxu2 %vm310_vm0, %v3569_v44  ;;  %v4201_v44 = vld [vmem:[%s4174_s11 + $0x70] sm:$0xff]  ;;  %v763_v47 = vadd.f32 %v759_v30, %v587_v29 }
 0x11a   : > { %2941 = vmatpush.xpose.msk.msrb.mxu3 %vm310_vm0, %v3572_v45  ;;  %2858 = vmatmul.msk.f32.vlgmr.msrb.gmra.mxu0 %vm310_vm0, %v2841_v41  ;;  %v2973_v45 = vld [vmem:[%s3346_s9 + $0x19a] sm:$0xff]  ;;  %v3136_v29 = vld [vmem:[%s4174_s11 + $0x92] sm:$0xff] }
 0x11b   : > { %2976 = vmatpush.xpose.msk.msra.mxu0 %vm310_vm0, %v3844_v35  ;;  %2875 = vmatmul.msk.f32.vlgmr.msrb.gmra.mxu1 %vm310_vm0, %v2841_v41  ;;  %v739_v35 = vpop.f32.mrf.mxu0 }
 0x11c   : > { %2993 = vmatpush.xpose.msk.msra.mxu1 %vm310_vm0, %v2974_v36  ;;  %2925 = vmatmul.msk.f32.vlgmr.msrb.gmra.mxu2 %vm310_vm0, %v2908_v31  ;;  %v762_v55 = vadd.f32 %v739_v35, %v567_v34  ;;  %v3082_v34 = vld [vmem:[%s4174_s11 + $0x82] sm:$0xff]  ;;  %v3083_v36 = vld [vmem:[%s4591_s3 + $0x14] sm:$0xf] }
 0x11d   : > { %3011 = vmatpush.xpose.msk.msra.mxu2 %vm1837_vm1, %v4182_v40  ;;  %2942 = vmatmul.msk.f32.vlgmr.msrb.gmra.mxu3 %vm310_vm0, %v2908_v31 }
 0x11e   : > { %3020 = vmatpush.xpose.msk.msra.mxu3 %vm1837_vm1, %v4201_v44 }
 0x11f   : > { %2977 = vmatpush.xpose.msk.msra.mxu0 %vm310_vm0, %v3858_v38  ;;  %v915_v38 = vpop.f32.mrf.mxu2 }
 0x120   : > { %2994 = vmatpush.xpose.msk.msra.mxu1 %vm310_vm0, %v2973_v45  ;;  %v4234_v43 = vadd.f32 %v915_v38, %v762_v55  ;;  %v935_v1 = vpop.f32.mrf.mxu3  ;;  %v2355_v38 = vld [vmem:[%s4592_s4 + $0x78] sm:$0xff] }
 0x121   : > { %3012 = vmatpush.xpose.msk.msra.mxu2 %vm1837_vm1, %v4207_v51  ;;  %v4239_v4 = vadd.f32 %v935_v1, %v763_v47  ;;  %v2351_v1 = vld [vmem:[%s4592_s4 + $0x58] sm:$0xff] }
 0x122   : > { %3021 = vmatpush.xpose.msk.msra.mxu3 %vm1837_vm1, %v4218_v50 }
 0x123   : > { %2978 = vmatpush.xpose.msk.msra.mxu0 %vm310_vm0, %v3870_v19  ;;  %v4250_v19 = vld [vmem:[%s4174_s11 + $0x40] sm:$0xff] }
 0x124   : > { %2995 = vmatpush.xpose.msk.msra.mxu1 %vm310_vm0, %v3890_v42  ;;  %v4253_v42 = vld [vmem:[%s4174_s11 + $0x31] sm:$0xff] }
 0x125   : > { %3013 = vmatpush.xpose.msk.msra.mxu2 %vm1837_vm1, %v4221_v57 }
 0x126   : > { %3022 = vmatpush.xpose.msk.msra.mxu3 %vm1837_vm1, %v4232_v61 }
 0x127   : > { %2979 = vmatpush.xpose.msk.msra.mxu0 %vm310_vm0, %v3881_v46  ;;  %v4264_v46 = vld [vmem:[%s4174_s11 + $0x30] sm:$0xff] }
 0x128   : > { %2996 = vmatpush.xpose.msk.msra.mxu1 %vm310_vm0, %v3916_v54  ;;  %v4267_v54 = vld [vmem:[%s4174_s11 + $0x21] sm:$0xff] }
 0x129   : > { %3014 = vmatpush.xpose.msk.msra.mxu2 %vm1837_vm1, %v4237_v0 }
 0x12a   : > { %3023 = vmatpush.xpose.msk.msra.mxu3 %vm1837_vm1, %v4250_v19 }
 0x12b   : > { %2980 = vmatpush.xpose.msk.msra.mxu0 %vm310_vm0, %v3651_v53  ;;  %v4278_v53 = vld [vmem:[%s4174_s11 + $0x20] sm:$0xff] }
 0x12c   : > { %2997 = vmatpush.xpose.msk.msra.mxu1 %vm310_vm0, %v3654_v56  ;;  %v4281_v56 = vld [vmem:[%s4174_s11 + $0x11] sm:$0xff] }
 0x12d   : > { %3015 = vmatpush.xpose.msk.msra.mxu2 %vm1837_vm1, %v4253_v42 }
 0x12e   : > { %3024 = vmatpush.xpose.msk.msra.mxu3 %vm1837_vm1, %v4264_v46 }
 0x12f   : > { %2981 = vmatpush.xpose.msk.msra.mxu0 %vm310_vm0, %v3674_v60  ;;  %v1819_v60 = vld [vmem:[%s4174_s11 + $0x10] sm:$0xff] }
 0x130   : > { %2998 = vmatpush.xpose.msk.msra.mxu1 %vm310_vm0, %v3677_v62  ;;  %v1827_v62 = vld [vmem:[%s4174_s11 + $0x1] sm:$0xff] }
 0x131   : > { %3016 = vmatpush.xpose.msk.msra.mxu2 %vm1837_vm1, %v4267_v54 }
 0x132   : > { %3025 = vmatpush.xpose.msk.msra.mxu3 %vm1837_vm1, %v4278_v53 }
 0x133   : > { %2982 = vmatpush.xpose.msk.msra.mxu0 %vm310_vm0, %v3691_v58  ;;  %v1818_v58 = vld [vmem:[%s4174_s11] sm:$0xff] }
 0x134   : > { %2999 = vmatpush.xpose.msk.msra.mxu1 %vm310_vm0, %v3694_v59  ;;  %v3046_v59 = vld [vmem:[%s4174_s11 + $0x80] sm:$0xff] }
 0x135   : > { %3017 = vmatpush.xpose.msk.msra.mxu2 %vm1837_vm1, %v4281_v56 }
 0x136   : > { %3026 = vmatpush.xpose.msk.msra.mxu3 %vm1837_vm1, %v1819_v60 }
 0x137   : > { %2983 = vmatpush.xpose.msk.msra.mxu0 %vm310_vm0, %v3705_v63  ;;  %v3010_v63 = vld [vmem:[%s4591_s3 + $0x4] sm:$0xf] }
 0x138   : > { %3000 = vmatpush.xpose.msk.msra.mxu1 %vm310_vm0, %v3708_v52  ;;  %v1826_v52 = vld [vmem:[%s4591_s3] sm:$0xf] }
 0x139   : > { %3018 = vmatpush.xpose.msk.msra.mxu2 %vm1837_vm1, %v1827_v62  ;;  %v2343_v62 = vld [vmem:[%s4592_s4 + $0x18] sm:$0xff] }
 0x13a   : > { %3027 = vmatpush.xpose.msk.msra.mxu3 %vm1837_vm1, %v1818_v58  ;;  %v2341_v58 = vld [vmem:[%s4592_s4 + $0x8] sm:$0xff] }
 0x13b   : > { %2984 = vmatpush.xpose.msk.msra.mxu0 %vm310_vm0, %v3719_v2  ;;  %v4337_v2 = vld [vmem:[%s4174_s11 + $0x42] sm:$0xff] }
 0x13c   : > { %3001 = vmatpush.xpose.msk.msra.mxu1 %vm310_vm0, %v3722_v3  ;;  %3019 = vmatmul.msk.f32.vlgmr.msra.gmra.mxu2 %vm1837_vm1, %v3010_v63  ;;  %v4348_v3 = vld [vmem:[%s4174_s11 + $0x32] sm:$0xff] }
 0x13d   : > { %3030 = vmatpush.xpose.msk.msrb.mxu2 %vm1837_vm1, %v4294_v5  ;;  %3028 = vmatmul.msk.f32.vlgmr.msra.gmra.mxu3 %vm1837_vm1, %v1826_v52 }
 0x13e   : > { %3048 = vmatpush.xpose.msk.msrb.mxu3 %vm1837_vm1, %v3046_v59 }
 0x13f   : > { %2985 = vmatpush.xpose.msk.msra.mxu0 %vm310_vm0, %v3733_v6  ;;  %v4359_v6 = vld [vmem:[%s4174_s11 + $0x22] sm:$0xff] }
 0x140   : > { %3002 = vmatpush.xpose.msk.msra.mxu1 %vm310_vm0, %v3736_v49  ;;  %v4703_v49 = vld [vmem:[#allocation38_spill] sm:$0xff] }
 0x141   : > { %3031 = vmatpush.xpose.msk.msrb.mxu2 %vm1837_vm1, %v4307_v8 }
 0x142   : > { %3049 = vmatpush.xpose.msk.msrb.mxu3 %vm1837_vm1, %v4201_v44 }
 0x143   : > { %2986 = vmatpush.xpose.msk.msra.mxu0 %vm310_vm0, %v3743_v7  ;;  %v4370_v7 = vld [vmem:[%s4174_s11 + $0x12] sm:$0xff] }
 0x144   : > { %3003 = vmatpush.xpose.msk.msra.mxu1 %vm310_vm0, %v3750_v11  ;;  %v1932_v11 = vld [vmem:[%s4174_s11 + $0x2] sm:$0xff] }
 0x145   : > { %3032 = vmatpush.xpose.msk.msrb.mxu2 %vm1837_vm1, %v4324_v9 }
 0x146   : > { %3050 = vmatpush.xpose.msk.msrb.mxu3 %vm1837_vm1, %v4218_v50 }
 0x147   : > { %2987 = vmatpush.xpose.msk.msra.mxu0 %vm310_vm0, %v3771_v15  ;;  %v3100_v15 = vld [vmem:[%s4174_s11 + $0x90] sm:$0xff] }
 0x148   : > { %3004 = vmatpush.xpose.msk.msra.mxu1 %vm310_vm0, %v3774_v14  ;;  %v4702_v14 = vld [vmem:[#allocation37_spill] sm:$0xff] }
 0x149   : > { %3033 = vmatpush.xpose.msk.msrb.mxu2 %vm1837_vm1, %v4337_v2 }
 0x14a   : > { %3051 = vmatpush.xpose.msk.msrb.mxu3 %vm1837_vm1, %v4232_v61 }
 0x14b   : > { %2988 = vmatpush.xpose.msk.msra.mxu0 %vm310_vm0, %v3785_v10  ;;  %v4704_v10 = vld [vmem:[#allocation39_spill] sm:$0xff] }
 0x14c   : > { %3005 = vmatpush.xpose.msk.msra.mxu1 %vm310_vm0, %v3788_v48  ;;  %v2975_v48 = vld [vmem:[%s4590_s2 + $0x20] sm:$0xf] }
 0x14d   : > { %3034 = vmatpush.xpose.msk.msrb.mxu2 %vm1837_vm1, %v4348_v3 }
 0x14e   : > { %3052 = vmatpush.xpose.msk.msrb.mxu3 %vm1837_vm1, %v4250_v19 }
 0x14f   : > { %2989 = vmatpush.xpose.msk.msra.mxu0 %vm310_vm0, %v3799_v22  ;;  %v3064_v22 = vld [vmem:[%s4174_s11 + $0x81] sm:$0xff] }
 0x150   : > { %3006 = vmatpush.xpose.msk.msra.mxu1 %vm310_vm0, %v3802_v23  ;;  %v3118_v23 = vld [vmem:[%s4174_s11 + $0x91] sm:$0xff] }
 0x151   : > { %3035 = vmatpush.xpose.msk.msrb.mxu2 %vm1837_vm1, %v4359_v6 }
 0x152   : > { %3053 = vmatpush.xpose.msk.msrb.mxu3 %vm1837_vm1, %v4264_v46 }
 0x153   : > { %2990 = vmatpush.xpose.msk.msra.mxu0 %vm310_vm0, %v4702_v14 }
 0x154   : > { %3007 = vmatpush.xpose.msk.msra.mxu1 %vm310_vm0, %v4703_v49 }
 0x155   : > { %3036 = vmatpush.xpose.msk.msrb.mxu2 %vm1837_vm1, %v4370_v7 }
 0x156   : > { %3054 = vmatpush.xpose.msk.msrb.mxu3 %vm1837_vm1, %v4278_v53 }
 0x157   : > { %2991 = vmatpush.xpose.msk.msra.mxu0 %vm310_vm0, %v4704_v10  ;;  %v1090_v16 = vpop.f32.mrf.mxu0 }
 0x158   : > { %3008 = vmatpush.xpose.msk.msra.mxu1 %vm310_vm0, %v4705_v26  ;;  %v1110_v17 = vpop.f32.mrf.mxu1  ;;  %v1113_v20 = vadd.f32 %v1090_v16, %v4234_v43  ;;  %v2353_v43 = vld [vmem:[%s4592_s4 + $0x68] sm:$0xff] }
 0x159   : > { %3037 = vmatpush.xpose.msk.msrb.mxu2 %vm1837_vm1, %v1932_v11  ;;  %v1114_v21 = vadd.f32 %v1110_v17, %v4239_v4  ;;  %v2348_v4 = vld [vmem:[%s4592_s4 + $0x40] sm:$0xff] }
 0x15a   : > { %3055 = vmatpush.xpose.msk.msrb.mxu3 %vm1837_vm1, %v1819_v60  ;;  %2992 = vmatmul.msk.f32.vlgmr.msra.gmra.mxu0 %vm310_vm0, %v2975_v48  ;;  %v2342_v60 = vld [vmem:[%s4592_s4 + $0x10] sm:$0xff] }
 0x15b   : > { %3066 = vmatpush.xpose.msk.msrb.mxu0 %vm1837_vm1, %v3064_v22  ;;  %3009 = vmatmul.msk.f32.vlgmr.msra.gmra.mxu1 %vm310_vm0, %v2975_v48 }
 0x15c   : > { %3084 = vmatpush.xpose.msk.msrb.mxu1 %vm1837_vm1, %v3082_v34  ;;  %3038 = vmatmul.msk.f32.vlgmr.msrb.gmra.mxu2 %vm1837_vm1, %v3029_v12 }
 0x15d   : > { %3102 = vmatpush.xpose.msk.msra.mxu2 %vm1837_vm1, %v3100_v15  ;;  %3056 = vmatmul.msk.f32.vlgmr.msrb.gmra.mxu3 %vm1837_vm1, %v3047_v13 }
 0x15e   : > { %3120 = vmatpush.xpose.msk.msra.mxu3 %vm1837_vm1, %v3118_v23 }
 0x15f   : > { %3067 = vmatpush.xpose.msk.msrb.mxu0 %vm1837_vm1, %v4182_v40  ;;  %v1265_v24 = vpop.f32.mrf.mxu2 }
 0x160   : > { %3085 = vmatpush.xpose.msk.msrb.mxu1 %vm1837_vm1, %v4294_v5  ;;  %v1285_v25 = vpop.f32.mrf.mxu3  ;;  %v1288_v39 = vadd.f32 %v1265_v24, %v1113_v20 }
 0x161   : > { %3103 = vmatpush.xpose.msk.msra.mxu2 %vm1837_vm1, %v3046_v59  ;;  %v1289_v18 = vadd.f32 %v1285_v25, %v1114_v21 }
 0x162   : > { %3121 = vmatpush.xpose.msk.msra.mxu3 %vm1837_vm1, %v3064_v22 }
 0x163   : > { %3068 = vmatpush.xpose.msk.msrb.mxu0 %vm1837_vm1, %v4207_v51 }
 0x164   : > { %3086 = vmatpush.xpose.msk.msrb.mxu1 %vm1837_vm1, %v4307_v8 }
 0x165   : > { %3104 = vmatpush.xpose.msk.msra.mxu2 %vm1837_vm1, %v4201_v44 }
 0x166   : > { %3122 = vmatpush.xpose.msk.msra.mxu3 %vm1837_vm1, %v4182_v40 }
 0x167   : > { %3069 = vmatpush.xpose.msk.msrb.mxu0 %vm1837_vm1, %v4221_v57 }
 0x168   : > { %3087 = vmatpush.xpose.msk.msrb.mxu1 %vm1837_vm1, %v4324_v9 }
 0x169   : > { %3105 = vmatpush.xpose.msk.msra.mxu2 %vm1837_vm1, %v4218_v50 }
 0x16a   : > { %3123 = vmatpush.xpose.msk.msra.mxu3 %vm1837_vm1, %v4207_v51 }
 0x16b   : > { %3070 = vmatpush.xpose.msk.msrb.mxu0 %vm1837_vm1, %v4237_v0 }
 0x16c   : > { %3088 = vmatpush.xpose.msk.msrb.mxu1 %vm1837_vm1, %v4337_v2 }
 0x16d   : > { %3106 = vmatpush.xpose.msk.msra.mxu2 %vm1837_vm1, %v4232_v61  ;;  %v2352_v61 = vld [vmem:[%s4592_s4 + $0x60] sm:$0xff] }
 0x16e   : > { %3124 = vmatpush.xpose.msk.msra.mxu3 %vm1837_vm1, %v4221_v57  ;;  %v2354_v57 = vld [vmem:[%s4592_s4 + $0x70] sm:$0xff] }
 0x16f   : > { %3071 = vmatpush.xpose.msk.msrb.mxu0 %vm1837_vm1, %v4253_v42 }
 0x170   : > { %3089 = vmatpush.xpose.msk.msrb.mxu1 %vm1837_vm1, %v4348_v3 }
 0x171   : > { %3107 = vmatpush.xpose.msk.msra.mxu2 %vm1837_vm1, %v4250_v19  ;;  %v2349_v19 = vld [vmem:[%s4592_s4 + $0x48] sm:$0xff] }
 0x172   : > { %3125 = vmatpush.xpose.msk.msra.mxu3 %vm1837_vm1, %v4237_v0  ;;  %v2350_v0 = vld [vmem:[%s4592_s4 + $0x50] sm:$0xff] }
 0x173   : > { %3072 = vmatpush.xpose.msk.msrb.mxu0 %vm1837_vm1, %v4267_v54 }
 0x174   : > { %3090 = vmatpush.xpose.msk.msrb.mxu1 %vm1837_vm1, %v4359_v6 }
 0x175   : > { %3108 = vmatpush.xpose.msk.msra.mxu2 %vm1837_vm1, %v4264_v46  ;;  %v2347_v46 = vld [vmem:[%s4592_s4 + $0x38] sm:$0xff] }
 0x176   : > { %3126 = vmatpush.xpose.msk.msra.mxu3 %vm1837_vm1, %v4253_v42  ;;  %v2346_v42 = vld [vmem:[%s4592_s4 + $0x30] sm:$0xff] }
 0x177   : > { %3073 = vmatpush.xpose.msk.msrb.mxu0 %vm1837_vm1, %v4281_v56 }
 0x178   : > { %3091 = vmatpush.xpose.msk.msrb.mxu1 %vm1837_vm1, %v4370_v7 }
 0x179   : > { %3109 = vmatpush.xpose.msk.msra.mxu2 %vm1837_vm1, %v4278_v53  ;;  %v2345_v53 = vld [vmem:[%s4592_s4 + $0x28] sm:$0xff] }
 0x17a   : > { %3127 = vmatpush.xpose.msk.msra.mxu3 %vm1837_vm1, %v4267_v54  ;;  %3074 = vmatmul.msk.f32.vlgmr.msrb.gmra.mxu0 %vm1837_vm1, %v3065_v32  ;;  %v2344_v54 = vld [vmem:[%s4592_s4 + $0x20] sm:$0xff] }
 0x17b   : > { %3138 = vmatpush.xpose.msk.msra.mxu0 %vm1837_vm1, %v3136_v29  ;;  %3092 = vmatmul.msk.f32.vlgmr.msrb.gmra.mxu1 %vm1837_vm1, %v3083_v36 }
 0x17c   : > { %3110 = vmatmul.msk.f32.vlgmr.msra.gmra.mxu2 %vm1837_vm1, %v3101_v28  ;;  %2368 = vmatpush.msra.mxu1 %v2354_v57 }
 0x17d   : > { %3128 = vmatmul.msk.f32.vlgmr.msra.gmra.mxu3 %vm1837_vm1, %v3119_v33  ;;  %2388 = vmatpush.msrb.mxu2 %v2355_v38 }
 0x17e   : > { %2369 = vmatpush.msra.mxu1 %v2352_v61 }
 0x17f   : > { %3139 = vmatpush.xpose.msk.msra.mxu0 %vm1837_vm1, %v3082_v34  ;;  %2389 = vmatpush.msrb.mxu2 %v2353_v43 }
 0x180   : > { %2370 = vmatpush.msra.mxu1 %v2350_v0 }
 0x181   : > { %2390 = vmatpush.msrb.mxu2 %v2351_v1 }
 0x182   : > { %2371 = vmatpush.msra.mxu1 %v2348_v4 }
 0x183   : > { %3140 = vmatpush.xpose.msk.msra.mxu0 %vm1837_vm1, %v4294_v5  ;;  %2391 = vmatpush.msrb.mxu2 %v2349_v19  ;;  %v2340_v5 = vld [vmem:[%s4592_s4] sm:$0xff] }
 0x184   : > { %2372 = vmatpush.msra.mxu1 %v2346_v42 }
 0x185   : > { %2392 = vmatpush.msrb.mxu2 %v2347_v46 }
 0x186   : > { %2373 = vmatpush.msra.mxu1 %v2344_v54 }
 0x187   : > { %3141 = vmatpush.xpose.msk.msra.mxu0 %vm1837_vm1, %v4307_v8  ;;  %2393 = vmatpush.msrb.mxu2 %v2345_v53 }
 0x188   : > { %2374 = vmatpush.msra.mxu1 %v2342_v60 }
 0x189   : > { %2394 = vmatpush.msrb.mxu2 %v2343_v62 }
 0x18a   : > { %2375 = vmatpush.msra.mxu1 %v2340_v5 }
 0x18b   : > { %3142 = vmatpush.xpose.msk.msra.mxu0 %vm1837_vm1, %v4324_v9  ;;  %2395 = vmatpush.msrb.mxu2 %v2341_v58 }
 0x18f   : > { %3143 = vmatpush.xpose.msk.msra.mxu0 %vm1837_vm1, %v4337_v2 }
 0x193   : > { %3144 = vmatpush.xpose.msk.msra.mxu0 %vm1837_vm1, %v4348_v3 }
 0x197   : > { %3145 = vmatpush.xpose.msk.msra.mxu0 %vm1837_vm1, %v4359_v6  ;;  %v1441_v27 = vpop.f32.mrf.mxu0 }
 0x198   : > { %v1464_v40 = vadd.f32 %v1441_v27, %v1288_v39  ;;  %v1461_v41 = vpop.f32.mrf.mxu1 }
 0x199   : > { %v1465_v31 = vadd.f32 %v1461_v41, %v1289_v18 }
 0x19a   : > { %3146 = vmatmul.msk.f32.vlgmr.msra.gmra.mxu0 %vm1837_vm1, %v3137_v37 }
 0x19f   : > { %v1616_v44 = vpop.f32.mrf.mxu2 }
 0x1a0   : > { %v1639_v45 = vadd.f32 %v1616_v44, %v1464_v40  ;;  %v1636_v51 = vpop.f32.mrf.mxu3 }
 0x1a1   : > { %v1640_v35 = vadd.f32 %v1636_v51, %v1465_v31 }
 0x1bf   : > { %v1882_v56 = vpop.f32.mrf.mxu2 }
 0x1c0   : > { %v1929_v59 = vpop.f32.mrf.mxu3 }
 0x1c1   : > { %v1930_v8 = vadd.f32 %v1929_v59, %v1882_v56 }
 0x1d7   : > { %v1791_v55 = vpop.f32.mrf.mxu0 }
 0x1d8   : > { %v4505_v30 = vadd.f32 %v1791_v55, %v1639_v45  ;;  %v1811_v50 = vpop.f32.mrf.mxu1 }
 0x1d9   : > { %v1815_v47 = vadd.f32 %v1811_v50, %v1640_v35 }
 0x1df   : > { %v1986_v63 = vpop.f32.mrf.mxu2 }
 0x1e0   : > { %v1989_v52 = vadd.f32 %v1986_v63, %v1930_v8  ;;  %v2045_v9 = vpop.f32.mrf.mxu3 }
 0x1e2   : > { %v2048_v2 = vadd.f32 %v2045_v9, %v1989_v52 }
 0x1f7   : > { %v2103_v3 = vpop.f32.mrf.mxu0 }
 0x1f8   : > { %v2106_v6 = vadd.f32 %v2103_v3, %v2048_v2  ;;  %v2161_v7 = vpop.f32.mrf.mxu1 }
 0x1fa   : > { %v2164_v11 = vadd.f32 %v2161_v7, %v2106_v6 }
 0x1ff   : > { %v2220_v14 = vpop.f32.mrf.mxu2 }
 0x200   : > { %v2223_v15 = vadd.f32 %v2220_v14, %v2164_v11  ;;  %v2278_v49 = vpop.f32.mrf.mxu3 }
 0x202   : > { %v2281_v22 = vadd.f32 %v2278_v49, %v2223_v15 }
 0x217   : > { %v2336_v23 = vpop.f32.mrf.mxu0 }
 0x218   : > { %v2339_v10 = vadd.f32 %v2336_v23, %v2281_v22 }
 0x21a   : > { %3147 = vmatmul.msk.f32.vlgmr.msra.gmra.mxu1 %vm2356_vm2, %v2339_v10  ;;  %3148 = vmatmul.msk.f32.vlgmr.msrb.gmra.mxu2 %vm2356_vm2, %v2339_v10 }
 0x297   : > { %v2377_v48 = vpop.f32.mrf.mxu1 }
 0x298   : > { %v2400_v12 = vadd.f32 %v2377_v48, %v4505_v30 }
 0x29d   : > { %v2397_v34 = vpop.f32.mrf.mxu2 }
 0x29e   : > { %v2401_v26 = vadd.f32 %v2397_v34, %v1815_v47 }
 0x2a0   : > { %v2404_v13 = vrot.slane %v2401_v26, 4 }
 0x2a2   : > { %v2406_v16 = vsel %vm2405_vm3, %v2400_v12, %v2404_v13 }
 0x2a3   : > { %2408 = vst [vmem:[%s232_s10] sm:$0xff] %v2406_v16 }
 0x2a4   : > { %3223 = shalt.err (!%p3220_p3)
}
 0x2a5   : > { %3157 = dma.vmem_to_hbm [thread:$0]  (%p3328_p5), %s2424_s30, 128, %s2426_s12, %s2410_s22  }
 0x2a6 PF: > { %p3163_p4 = scmp.ge.s32.totalorder %s3258_s21, 2  ;;  %s2437_s23 = sand.u32 1, %s3246_s18  }
 0x2a7   : > { %s2438_s25 = scalar_lea.sflag [#allocation3], %s2437_s23 }
 0x2a8   : > { %p3160_p7 = pnand %p3163_p4, %p3332_p6 }
 0x2aa   : > { %p3161_p8 = pneg %p3160_p7 }
 0x2ac   : > { %3241 = dma.done.wait (%p3161_p8), %s2438_s25, 128  }
 0x2ad   : > { %3243 = vsyncadd (%p3161_p8), %s2438_s25, 4294967168  ;;  %p15_p9 = scmp.ge.s32.totalorder %s3315_s24, 4   ;;  %s4706_s18 = smov %s3250_s19 }
 0x2ae   : > { %s4707_s19 = smov %s3254_s20  ;;  %s4708_s20 = smov %s3326_s27 }
 0x2af   : > { %s4709_s21 = smov %s3315_s24  ;;  %17 = sbr.rel (!%p15_p9) target bundleno = 3 (0x3), region = 98 }
 0x2b4   :  { %2444 = vsyncpa [#allocation3], 1 }
 0x2b5   :  { %2446 = vsyncpa [#allocation3 + $0x1], 1 }

</bundles_post_ra>
